<compile_context>
chip_gen: v6e
topology: v6e:2x2x1
jax: 0.10.0
libtpu: 0.0.40
codegen_flags: <defaults>
</compile_context>

<pallas_src>
import jax
import jax.numpy as jnp
from jax import lax
from jax.experimental import pallas as pl
from jax.experimental.pallas import tpu as pltpu


def _make_kernel(L, Lp, T, H, Cin, Cout, K, B, stride, pad, eps, n_total):
    f32 = jnp.float32
    inv_count = 1.0 / float(n_total * T)   # BN normalizes with biased variance

    def kernel(x_ref, w1_ref, b1_ref, w2_ref, b2_ref, w3_ref, b3_ref,
               gamma_ref, beta_ref, ws_ref, bs_ref,
               out_ref,
               h1p_ref, g_ref, scf_ref, h3_ref, sc_ref, acc_ref, stat_ref):
        p = pl.program_id(0)   # phase: 0 = conv tower + shortcut + stat accum,
        n = pl.program_id(1)   #        1 = BN finalize + add + ReLU

        # ---------------- phase 0: conv1 -> ReLU -> conv2 -> ReLU -> conv3 ----
        @pl.when(p == 0)
        def _conv_tower():
            @pl.when(n == 0)
            def _init_once():
                # Zero-fill happens exactly once: the pad rows of h1p are never
                # overwritten afterwards, and the BN accumulators start at 0.
                h1p_ref[...] = jnp.zeros((B * Lp, H), f32)
                acc_ref[...] = jnp.zeros((2, Cout, 1), f32)

            # NCL block -> (positions, channels) rows for the MXU (in-kernel
            # transpose on the XLU slot; no wrapper-level HBM relayout).
            x_blk = x_ref[...]                                        # (B,Cin,L)
            x_flat = jnp.transpose(x_blk, (0, 2, 1)).reshape(B * L, Cin)

            # conv1 (1x1) + ReLU: one (B*L, Cin) x (Cin, H) matmul.
            h1 = jnp.maximum(
                jnp.dot(x_flat, w1_ref[...], preferred_element_type=f32)
                + b1_ref[...], 0.0)                                   # (B*L, H)

            # Write only the data rows of the zero-padded buffer.
            for b in range(B):
                h1p_ref[pl.ds(b * Lp + pad, L), :] = h1[b * L:(b + 1) * L, :]

            # conv2 tap gather: strided sublane slices written straight into a
            # preallocated (B*T, K*H) scratch (no concatenate copies).
            for b in range(B):
                for k in range(K):
                    g_ref[pl.ds(b * T, T), pl.ds(k * H, H)] = (
                        h1p_ref[pl.ds(b * Lp + k, T, stride=stride), :])

            # conv2 + ReLU: all K taps contracted in ONE MXU matmul.
            h2 = jnp.maximum(
                jnp.dot(g_ref[...], w2_ref[...], preferred_element_type=f32)
                + b2_ref[...], 0.0)                                   # (B*T, H)

            # conv3 (1x1), pre-BN.
            h3 = (jnp.dot(h2, w3_ref[...], preferred_element_type=f32)
                  + b3_ref[...])                                      # (B*T, Cout)

            # Store channel-major so the phase-1 output store is direct & lane
            # dense (T on lanes at realistic sizes).
            h3_cm = jnp.transpose(h3.reshape(B, T, Cout), (0, 2, 1))  # (B,Cout,T)
            h3_ref[n] = h3_cm

            # One-pass BN stats: running f32 sum / sum-of-squares per channel.
            acc_ref[0] = acc_ref[0] + jnp.sum(
                jnp.sum(h3_cm, axis=2, keepdims=True), axis=0)        # (Cout,1)
            acc_ref[1] = acc_ref[1] + jnp.sum(
                jnp.sum(h3_cm * h3_cm, axis=2, keepdims=True), axis=0)

            # Strided 1x1 shortcut: full-length 1x1 matmul, then stride-2 row
            # selection via sublane-strided slices of a scratch.
            scf_ref[...] = (jnp.dot(x_flat, ws_ref[...],
                                    preferred_element_type=f32)
                            + bs_ref[...])                            # (B*L, Cout)
            sc_rows = [scf_ref[pl.ds(b * L, T, stride=stride), :][None, :, :]
                       for b in range(B)]                             # B x (1,T,Cout)
            sc_ref[n] = jnp.transpose(jnp.concatenate(sc_rows, axis=0),
                                      (0, 2, 1))                      # (B,Cout,T)

        # ------ phase 1 (first step): finalize mean/var from accumulators -----
        @pl.when((p == 1) & (n == 0))
        def _bn_finalize_stats():
            mean = acc_ref[0] * inv_count                             # (Cout,1)
            var = jnp.maximum(acc_ref[1] * inv_count - mean * mean, 0.0)
            inv_std = lax.rsqrt(var + eps)
            scale = gamma_ref[...] * inv_std                          # (Cout,1)
            stat_ref[0] = scale
            stat_ref[1] = beta_ref[...] - mean * scale

        # ---------------- phase 1: normalize + shortcut + final ReLU ----------
        @pl.when(p == 1)
        def _finalize():
            h = h3_ref[n] * stat_ref[0] + stat_ref[1] + sc_ref[n]     # (B,Cout,T)
            out_ref[...] = jnp.maximum(h, 0.0)       # NCL layout, no transpose

    return kernel


def tsy_residual_block_forward(x, params, kernel_size=4, stride=2, eps=1e-5,
                               block_batch=None):
    """x: (N, C_in, L) float32 (PyTorch NCL). Returns (N, C_out, T) in NCL."""
    w1, b1, w2, b2, w3, b3, gamma, beta, ws, bs = params
    N, Cin, L = x.shape
    H = w1.shape[0]
    Cout = w3.shape[0]
    K = kernel_size
    pad = (kernel_size - 1) // 2 + 1
    T = (L + 2 * pad - K) // stride + 1            # conv2 output length
    T_sc = (L - 1) // stride + 1                   # shortcut output length
    assert T == T_sc, "residual add requires matching lengths (odd L for k=4,s=2)"
    Lp = L + 2 * pad

    # Batch elements per grid step (keeps matmul M-dim fed without huge blocks).
    if block_batch is None:
        cap = max(1, 256 // max(L, 1))
        block_batch = 1
        for b in range(1, N + 1):
            if N % b == 0 and b <= cap:
                block_batch = b
    B = int(block_batch)
    assert N % B == 0, "block_batch must divide N"
    Nb = N // B

    # Weights flattened to plain (in, out) matrices; conv2 taps are stacked
    # along the contraction dim so conv2 is one MXU matmul.
    f32 = jnp.float32
    w1_m = jnp.transpose(w1[:, :, 0]).astype(f32)                  # (Cin, H)
    w2_f = (jnp.transpose(w2, (2, 1, 0))                           # (K, Hin, Hout)
            .reshape(K * H, H).astype(f32))                        # (K*H, H)
    w3_m = jnp.transpose(w3[:, :, 0]).astype(f32)                  # (H, Cout)
    ws_m = jnp.transpose(ws[:, :, 0]).astype(f32)                  # (Cin, Cout)
    b1_r = b1.reshape(1, H).astype(f32)
    b2_r = b2.reshape(1, H).astype(f32)
    b3_r = b3.reshape(1, Cout).astype(f32)
    bs_r = bs.reshape(1, Cout).astype(f32)
    g_r = gamma.reshape(Cout, 1).astype(f32)
    be_r = beta.reshape(Cout, 1).astype(f32)

    kernel = _make_kernel(L, Lp, T, H, Cin, Cout, K, B, stride, pad, eps, N)

    def _const2(p, n):
        return (0, 0)

    in_specs = [
        # x: one B-sized batch block per phase-0 step; pinned to block 0 during
        # phase 1 (not needed there) so it is not re-fetched every step.
        pl.BlockSpec((B, Cin, L), lambda p, n: (n * (1 - p), 0, 0)),
        pl.BlockSpec((Cin, H), _const2),        # w1
        pl.BlockSpec((1, H), _const2),          # b1
        pl.BlockSpec((K * H, H), _const2),      # w2 (taps stacked on contraction)
        pl.BlockSpec((1, H), _const2),          # b2
        pl.BlockSpec((H, Cout), _const2),       # w3
        pl.BlockSpec((1, Cout), _const2),       # b3
        pl.BlockSpec((Cout, 1), _const2),       # gamma
        pl.BlockSpec((Cout, 1), _const2),       # beta
        pl.BlockSpec((Cin, Cout), _const2),     # ws (shortcut)
        pl.BlockSpec((1, Cout), _const2),       # bs
    ]
    # Output block index is 0 during phase 0 (never written there; it is exactly
    # the block phase 1 writes first, so indices stay non-decreasing and only
    # fully-written blocks are flushed to HBM) and n during phase 1.
    out_spec = pl.BlockSpec((B, Cout, T), lambda p, n: (n * p, 0, 0))

    # Derive the VMEM limit from the actual buffers (persistent scratch +
    # double-buffered x/out blocks + weights), clamped for v7x's 64 MiB VMEM.
    persistent = 4 * (B * Lp * H + B * T * K * H + B * L * Cout
                      + 2 * Nb * B * Cout * T + 2 * 2 * Cout)
    pipelined = 2 * 4 * (B * Cin * L + B * Cout * T)
    weights_b = 2 * 4 * (Cin * H + H + K * H * H + H + H * Cout + Cout
                         + 2 * Cout + Cin * Cout + Cout)
    need = persistent + pipelined + weights_b
    vmem_limit = int(min(max(2 * need + (4 << 20), 16 << 20), 48 << 20))

    # TODO(synk): BatchNorm running_mean/running_var buffer updates (training
    # side effect) are not emitted; they do not affect this forward output.
    out_ncl = pl.pallas_call(
        kernel,
        grid=(2, Nb),
        in_specs=in_specs,
        out_specs=out_spec,
        out_shape=jax.ShapeDtypeStruct((N, Cout, T), jnp.float32),
        scratch_shapes=[
            pltpu.VMEM((B * Lp, H), jnp.float32),       # zero-padded h1
            pltpu.VMEM((B * T, K * H), jnp.float32),    # gathered conv2 input
            pltpu.VMEM((B * L, Cout), jnp.float32),     # full-length 1x1 shortcut
            pltpu.VMEM((Nb, B, Cout, T), jnp.float32),  # pre-BN conv3 output
            pltpu.VMEM((Nb, B, Cout, T), jnp.float32),  # strided shortcut branch
            pltpu.VMEM((2, Cout, 1), jnp.float32),      # BN sum / sum-of-squares
            pltpu.VMEM((2, Cout, 1), jnp.float32),      # BN scale / shift
        ],
        compiler_params=pltpu.CompilerParams(
            dimension_semantics=("arbitrary", "arbitrary"),
            vmem_limit_bytes=vmem_limit),
    )(x.astype(jnp.float32), w1_m, b1_r, w2_f, b2_r, w3_m, b3_r,
      g_r, be_r, ws_m, bs_r)

    return out_ncl                                   # already (N, Cout, T) NCL


def reference_forward(x, params, kernel_size=4, stride=2, eps=1e-5):
    """Pure-JAX reference mirroring the PyTorch forward (training-mode BN)."""
    w1, b1, w2, b2, w3, b3, gamma, beta, ws, bs = params
    padding = (kernel_size - 1) // 2 + 1
    dn = ('NCW', 'OIW', 'NCW')
    h = lax.conv_general_dilated(x, w1, (1,), [(0, 0)], dimension_numbers=dn) + b1[None, :, None]
    h = jnp.maximum(h, 0.0)
    h = lax.conv_general_dilated(h, w2, (stride,), [(padding, padding)],
                                 dimension_numbers=dn) + b2[None, :, None]
    h = jnp.maximum(h, 0.0)
    h = lax.conv_general_dilated(h, w3, (1,), [(0, 0)], dimension_numbers=dn) + b3[None, :, None]
    mean = jnp.mean(h, axis=(0, 2), keepdims=True)
    var = jnp.mean((h - mean) ** 2, axis=(0, 2), keepdims=True)
    h = (h - mean) / jnp.sqrt(var + eps) * gamma[None, :, None] + beta[None, :, None]
    sc = lax.conv_general_dilated(x, ws, (stride,), [(0, 0)],
                                  dimension_numbers=dn) + bs[None, :, None]
    return jnp.maximum(h + sc, 0.0)


if __name__ == "__main__":
    # L must be odd so conv2 and the strided shortcut give equal lengths
    # (as the PyTorch module implicitly requires for the residual add).
    N, Cin, Cout, H, L = 4, 4, 8, 16, 17
    K, stride = 4, 2

    key = jax.random.PRNGKey(0)
    keys = jax.random.split(key, 11)
    x = jax.random.normal(keys[0], (N, Cin, L), jnp.float32)

    params = (
        0.2 * jax.random.normal(keys[1], (H, Cin, 1), jnp.float32),    # conv1 weight
        0.1 * jax.random.normal(keys[2], (H,), jnp.float32),           # conv1 bias
        0.1 * jax.random.normal(keys[3], (H, H, K), jnp.float32),      # conv2 weight
        0.1 * jax.random.normal(keys[4], (H,), jnp.float32),           # conv2 bias
        0.2 * jax.random.normal(keys[5], (Cout, H, 1), jnp.float32),   # conv3 weight
        0.1 * jax.random.normal(keys[6], (Cout,), jnp.float32),        # conv3 bias
        1.0 + 0.1 * jax.random.normal(keys[7], (Cout,), jnp.float32),  # BN gamma
        0.1 * jax.random.normal(keys[8], (Cout,), jnp.float32),        # BN beta
        0.2 * jax.random.normal(keys[9], (Cout, Cin, 1), jnp.float32), # shortcut weight
        0.1 * jax.random.normal(keys[10], (Cout,), jnp.float32),       # shortcut bias
    )

    # block_batch=2 -> grid (2 phases, 2 batch blocks): exercises the batched
    # MXU rows and the cross-step BN accumulator path.
    out = jax.block_until_ready(
        tsy_residual_block_forward(x, params, K, stride, block_batch=2))
    ref = reference_forward(x, params, K, stride)

    assert out.shape == ref.shape, (out.shape, ref.shape)
    max_diff = float(jnp.max(jnp.abs(out - ref)))
    assert bool(jnp.allclose(out, ref, rtol=5e-3, atol=5e-3)), (
        "max abs diff = %r" % max_diff)
    print("KERNEL_OK")
</pallas_src>

<mosaic_0001>
module attributes {stable_mosaic.version = 11 : i64} {
  func.func @kernel(%arg0: i32, %arg1: i32, %arg2: memref<2x4x17xf32, #tpu.memory_space<vmem>>, %arg3: memref<4x16xf32, #tpu.memory_space<vmem>>, %arg4: memref<1x16xf32, #tpu.memory_space<vmem>>, %arg5: memref<64x16xf32, #tpu.memory_space<vmem>>, %arg6: memref<1x16xf32, #tpu.memory_space<vmem>>, %arg7: memref<16x8xf32, #tpu.memory_space<vmem>>, %arg8: memref<1x8xf32, #tpu.memory_space<vmem>>, %arg9: memref<8x1xf32, #tpu.memory_space<vmem>>, %arg10: memref<8x1xf32, #tpu.memory_space<vmem>>, %arg11: memref<4x8xf32, #tpu.memory_space<vmem>>, %arg12: memref<1x8xf32, #tpu.memory_space<vmem>>, %arg13: memref<2x8x9xf32, #tpu.memory_space<vmem>>, %arg14: memref<42x16xf32, #tpu.memory_space<vmem>>, %arg15: memref<18x64xf32, #tpu.memory_space<vmem>>, %arg16: memref<34x8xf32, #tpu.memory_space<vmem>>, %arg17: memref<2x2x8x9xf32, #tpu.memory_space<vmem>>, %arg18: memref<2x2x8x9xf32, #tpu.memory_space<vmem>>, %arg19: memref<2x8x1xf32, #tpu.memory_space<vmem>>, %arg20: memref<2x8x1xf32, #tpu.memory_space<vmem>>) attributes {dimension_semantics = [#tpu.dimension_semantics<arbitrary>, #tpu.dimension_semantics<arbitrary>], iteration_bounds = array<i64: 2, 2>, scalar_prefetch = 0 : i64, scratch_operands = 7 : i64, tpu.core_type = #tpu.core_type<tc>, window_params = [{transform_indices = @transform_0, window_bounds = array<i64: 2, 4, 17>}, {pipeline_mode = #tpu.pipeline_mode<synchronous>, transform_indices = @transform_1, window_bounds = array<i64: 4, 16>}, {pipeline_mode = #tpu.pipeline_mode<synchronous>, transform_indices = @transform_2, window_bounds = array<i64: 1, 16>}, {pipeline_mode = #tpu.pipeline_mode<synchronous>, transform_indices = @transform_3, window_bounds = array<i64: 64, 16>}, {pipeline_mode = #tpu.pipeline_mode<synchronous>, transform_indices = @transform_4, window_bounds = array<i64: 1, 16>}, {pipeline_mode = #tpu.pipeline_mode<synchronous>, transform_indices = @transform_5, window_bounds = array<i64: 16, 8>}, {pipeline_mode = #tpu.pipeline_mode<synchronous>, transform_indices = @transform_6, window_bounds = array<i64: 1, 8>}, {pipeline_mode = #tpu.pipeline_mode<synchronous>, transform_indices = @transform_7, window_bounds = array<i64: 8, 1>}, {pipeline_mode = #tpu.pipeline_mode<synchronous>, transform_indices = @transform_8, window_bounds = array<i64: 8, 1>}, {pipeline_mode = #tpu.pipeline_mode<synchronous>, transform_indices = @transform_9, window_bounds = array<i64: 4, 8>}, {pipeline_mode = #tpu.pipeline_mode<synchronous>, transform_indices = @transform_10, window_bounds = array<i64: 1, 8>}, {transform_indices = @transform_11, window_bounds = array<i64: 2, 8, 9>}]} {
    %c0_i32 = arith.constant 0 : i32
    %0 = arith.cmpi eq, %arg0, %c0_i32 : i32
    %1 = arith.extui %0 : i1 to i32
    %c0_i32_0 = arith.constant 0 : i32
    %2 = arith.cmpi ne, %1, %c0_i32_0 : i32
    scf.if %2 {
      %c0_i32_5 = arith.constant 0 : i32
      %11 = arith.cmpi eq, %arg1, %c0_i32_5 : i32
      %12 = arith.extui %11 : i1 to i32
      %c0_i32_6 = arith.constant 0 : i32
      %13 = arith.cmpi ne, %12, %c0_i32_6 : i32
      scf.if %13 {
        %cst_84 = arith.constant 0.000000e+00 : f32
        %98 = vector.broadcast %cst_84 : f32 to vector<42x16xf32>
        %c0_85 = arith.constant 0 : index
        %c0_86 = arith.constant 0 : index
        %99 = vector.load %arg14[%c0_85, %c0_86] : memref<42x16xf32, #tpu.memory_space<vmem>>, vector<42x16xf32>
        tpu.vector_store %arg14[%c0_85, %c0_86], %98 {strides = array<i32>} : memref<42x16xf32, #tpu.memory_space<vmem>>, vector<42x16xf32>,
        %cst_87 = arith.constant 0.000000e+00 : f32
        %100 = vector.broadcast %cst_87 : f32 to vector<2x8x1xf32>
        %c0_88 = arith.constant 0 : index
        %c0_89 = arith.constant 0 : index
        %c0_90 = arith.constant 0 : index
        %101 = vector.load %arg19[%c0_88, %c0_89, %c0_90] : memref<2x8x1xf32, #tpu.memory_space<vmem>>, vector<2x8x1xf32>
        tpu.vector_store %arg19[%c0_88, %c0_89, %c0_90], %100 {strides = array<i32>} : memref<2x8x1xf32, #tpu.memory_space<vmem>>, vector<2x8x1xf32>,
      } else {
      }
      %c0 = arith.constant 0 : index
      %c0_7 = arith.constant 0 : index
      %c0_8 = arith.constant 0 : index
      %14 = vector.load %arg2[%c0, %c0_7, %c0_8] : memref<2x4x17xf32, #tpu.memory_space<vmem>>, vector<2x4x17xf32>
      %15 = tpu.transpose %14, [0, 2, 1] : vector<2x4x17xf32> -> vector<2x17x4xf32>
      %16 = vector.shape_cast %15 : vector<2x17x4xf32> to vector<34x4xf32>
      %c0_9 = arith.constant 0 : index
      %c0_10 = arith.constant 0 : index
      %17 = vector.load %arg3[%c0_9, %c0_10] : memref<4x16xf32, #tpu.memory_space<vmem>>, vector<4x16xf32>
      %cst = arith.constant dense<0.000000e+00> : vector<34x16xf32>
      %18 = tpu.matmul %16, %17, %cst {dimension_numbers = #tpu.dot_dimension_numbers<[1], [0], [0], [1], [0, 0, 1, 1], [], []>} : vector<34x4xf32>, vector<4x16xf32>, vector<34x16xf32> -> vector<34x16xf32>
      %c0_11 = arith.constant 0 : index
      %c0_12 = arith.constant 0 : index
      %19 = vector.load %arg4[%c0_11, %c0_12] : memref<1x16xf32, #tpu.memory_space<vmem>>, vector<1x16xf32>
      %20 = vector.broadcast %19 : vector<1x16xf32> to vector<34x16xf32>
      %21 = arith.addf %18, %20 : vector<34x16xf32>
      %cst_13 = arith.constant 0.000000e+00 : f32
      %22 = vector.broadcast %cst_13 : f32 to vector<34x16xf32>
      %23 = arith.maximumf %21, %22 : vector<34x16xf32>
      %24 = vector.extract_strided_slice %23 {offsets = [0, 0], sizes = [17, 16], strides = [1, 1]} : vector<34x16xf32> to vector<17x16xf32>
      %c2 = arith.constant 2 : index
      %c0_14 = arith.constant 0 : index
      %25 = vector.load %arg14[%c2, %c0_14] : memref<42x16xf32, #tpu.memory_space<vmem>>, vector<17x16xf32>
      tpu.vector_store %arg14[%c2, %c0_14], %24 {strides = array<i32>} : memref<42x16xf32, #tpu.memory_space<vmem>>, vector<17x16xf32>,
      %26 = vector.extract_strided_slice %23 {offsets = [17, 0], sizes = [17, 16], strides = [1, 1]} : vector<34x16xf32> to vector<17x16xf32>
      %c23 = arith.constant 23 : index
      %c0_15 = arith.constant 0 : index
      %27 = vector.load %arg14[%c23, %c0_15] : memref<42x16xf32, #tpu.memory_space<vmem>>, vector<17x16xf32>
      tpu.vector_store %arg14[%c23, %c0_15], %26 {strides = array<i32>} : memref<42x16xf32, #tpu.memory_space<vmem>>, vector<17x16xf32>,
      %c0_16 = arith.constant 0 : index
      %c0_17 = arith.constant 0 : index
      %28 = tpu.strided_load %arg14[%c0_16, %c0_17] {strides = array<i32: 2, 1>} : memref<42x16xf32, #tpu.memory_space<vmem>>, vector<9x16xf32>
      %c0_18 = arith.constant 0 : index
      %c0_19 = arith.constant 0 : index
      %29 = vector.load %arg15[%c0_18, %c0_19] : memref<18x64xf32, #tpu.memory_space<vmem>>, vector<9x16xf32>
      tpu.vector_store %arg15[%c0_18, %c0_19], %28 {strides = array<i32>} : memref<18x64xf32, #tpu.memory_space<vmem>>, vector<9x16xf32>,
      %c1 = arith.constant 1 : index
      %c0_20 = arith.constant 0 : index
      %30 = tpu.strided_load %arg14[%c1, %c0_20] {strides = array<i32: 2, 1>} : memref<42x16xf32, #tpu.memory_space<vmem>>, vector<9x16xf32>
      %c0_21 = arith.constant 0 : index
      %c16 = arith.constant 16 : index
      %31 = vector.load %arg15[%c0_21, %c16] : memref<18x64xf32, #tpu.memory_space<vmem>>, vector<9x16xf32>
      tpu.vector_store %arg15[%c0_21, %c16], %30 {strides = array<i32>} : memref<18x64xf32, #tpu.memory_space<vmem>>, vector<9x16xf32>,
      %c2_22 = arith.constant 2 : index
      %c0_23 = arith.constant 0 : index
      %32 = tpu.strided_load %arg14[%c2_22, %c0_23] {strides = array<i32: 2, 1>} : memref<42x16xf32, #tpu.memory_space<vmem>>, vector<9x16xf32>
      %c0_24 = arith.constant 0 : index
      %c32 = arith.constant 32 : index
      %33 = vector.load %arg15[%c0_24, %c32] : memref<18x64xf32, #tpu.memory_space<vmem>>, vector<9x16xf32>
      tpu.vector_store %arg15[%c0_24, %c32], %32 {strides = array<i32>} : memref<18x64xf32, #tpu.memory_space<vmem>>, vector<9x16xf32>,
      %c3 = arith.constant 3 : index
      %c0_25 = arith.constant 0 : index
      %34 = tpu.strided_load %arg14[%c3, %c0_25] {strides = array<i32: 2, 1>} : memref<42x16xf32, #tpu.memory_space<vmem>>, vector<9x16xf32>
      %c0_26 = arith.constant 0 : index
      %c48 = arith.constant 48 : index
      %35 = vector.load %arg15[%c0_26, %c48] : memref<18x64xf32, #tpu.memory_space<vmem>>, vector<9x16xf32>
      tpu.vector_store %arg15[%c0_26, %c48], %34 {strides = array<i32>} : memref<18x64xf32, #tpu.memory_space<vmem>>, vector<9x16xf32>,
      %c21 = arith.constant 21 : index
      %c0_27 = arith.constant 0 : index
      %36 = tpu.strided_load %arg14[%c21, %c0_27] {strides = array<i32: 2, 1>} : memref<42x16xf32, #tpu.memory_space<vmem>>, vector<9x16xf32>
      %c9 = arith.constant 9 : index
      %c0_28 = arith.constant 0 : index
      %37 = vector.load %arg15[%c9, %c0_28] : memref<18x64xf32, #tpu.memory_space<vmem>>, vector<9x16xf32>
      tpu.vector_store %arg15[%c9, %c0_28], %36 {strides = array<i32>} : memref<18x64xf32, #tpu.memory_space<vmem>>, vector<9x16xf32>,
      %c22 = arith.constant 22 : index
      %c0_29 = arith.constant 0 : index
      %38 = tpu.strided_load %arg14[%c22, %c0_29] {strides = array<i32: 2, 1>} : memref<42x16xf32, #tpu.memory_space<vmem>>, vector<9x16xf32>
      %c9_30 = arith.constant 9 : index
      %c16_31 = arith.constant 16 : index
      %39 = vector.load %arg15[%c9_30, %c16_31] : memref<18x64xf32, #tpu.memory_space<vmem>>, vector<9x16xf32>
      tpu.vector_store %arg15[%c9_30, %c16_31], %38 {strides = array<i32>} : memref<18x64xf32, #tpu.memory_space<vmem>>, vector<9x16xf32>,
      %c23_32 = arith.constant 23 : index
      %c0_33 = arith.constant 0 : index
      %40 = tpu.strided_load %arg14[%c23_32, %c0_33] {strides = array<i32: 2, 1>} : memref<42x16xf32, #tpu.memory_space<vmem>>, vector<9x16xf32>
      %c9_34 = arith.constant 9 : index
      %c32_35 = arith.constant 32 : index
      %41 = vector.load %arg15[%c9_34, %c32_35] : memref<18x64xf32, #tpu.memory_space<vmem>>, vector<9x16xf32>
      tpu.vector_store %arg15[%c9_34, %c32_35], %40 {strides = array<i32>} : memref<18x64xf32, #tpu.memory_space<vmem>>, vector<9x16xf32>,
      %c24 = arith.constant 24 : index
      %c0_36 = arith.constant 0 : index
      %42 = tpu.strided_load %arg14[%c24, %c0_36] {strides = array<i32: 2, 1>} : memref<42x16xf32, #tpu.memory_space<vmem>>, vector<9x16xf32>
      %c9_37 = arith.constant 9 : index
      %c48_38 = arith.constant 48 : index
      %43 = vector.load %arg15[%c9_37, %c48_38] : memref<18x64xf32, #tpu.memory_space<vmem>>, vector<9x16xf32>
      tpu.vector_store %arg15[%c9_37, %c48_38], %42 {strides = array<i32>} : memref<18x64xf32, #tpu.memory_space<vmem>>, vector<9x16xf32>,
      %c0_39 = arith.constant 0 : index
      %c0_40 = arith.constant 0 : index
      %44 = vector.load %arg15[%c0_39, %c0_40] : memref<18x64xf32, #tpu.memory_space<vmem>>, vector<18x64xf32>
      %c0_41 = arith.constant 0 : index
      %c0_42 = arith.constant 0 : index
      %45 = vector.load %arg5[%c0_41, %c0_42] : memref<64x16xf32, #tpu.memory_space<vmem>>, vector<64x16xf32>
      %cst_43 = arith.constant dense<0.000000e+00> : vector<18x16xf32>
      %46 = tpu.matmul %44, %45, %cst_43 {dimension_numbers = #tpu.dot_dimension_numbers<[1], [0], [0], [1], [0, 0, 1, 1], [], []>} : vector<18x64xf32>, vector<64x16xf32>, vector<18x16xf32> -> vector<18x16xf32>
      %c0_44 = arith.constant 0 : index
      %c0_45 = arith.constant 0 : index
      %47 = vector.load %arg6[%c0_44, %c0_45] : memref<1x16xf32, #tpu.memory_space<vmem>>, vector<1x16xf32>
      %48 = vector.broadcast %47 : vector<1x16xf32> to vector<18x16xf32>
      %49 = arith.addf %46, %48 : vector<18x16xf32>
      %cst_46 = arith.constant 0.000000e+00 : f32
      %50 = vector.broadcast %cst_46 : f32 to vector<18x16xf32>
      %51 = arith.maximumf %49, %50 : vector<18x16xf32>
      %c0_47 = arith.constant 0 : index
      %c0_48 = arith.constant 0 : index
      %52 = vector.load %arg7[%c0_47, %c0_48] : memref<16x8xf32, #tpu.memory_space<vmem>>, vector<16x8xf32>
      %cst_49 = arith.constant dense<0.000000e+00> : vector<18x8xf32>
      %53 = tpu.matmul %51, %52, %cst_49 {dimension_numbers = #tpu.dot_dimension_numbers<[1], [0], [0], [1], [0, 0, 1, 1], [], []>} : vector<18x16xf32>, vector<16x8xf32>, vector<18x8xf32> -> vector<18x8xf32>
      %c0_50 = arith.constant 0 : index
      %c0_51 = arith.constant 0 : index
      %54 = vector.load %arg8[%c0_50, %c0_51] : memref<1x8xf32, #tpu.memory_space<vmem>>, vector<1x8xf32>
      %55 = vector.broadcast %54 : vector<1x8xf32> to vector<18x8xf32>
      %56 = arith.addf %53, %55 : vector<18x8xf32>
      %57 = vector.shape_cast %56 : vector<18x8xf32> to vector<2x9x8xf32>
      %58 = tpu.transpose %57, [0, 2, 1] : vector<2x9x8xf32> -> vector<2x8x9xf32>
      %59 = arith.index_cast %arg1 : i32 to index
      %c0_52 = arith.constant 0 : index
      %c0_53 = arith.constant 0 : index
      %c0_54 = arith.constant 0 : index
      %60 = vector.load %arg17[%59, %c0_52, %c0_53, %c0_54] : memref<2x2x8x9xf32, #tpu.memory_space<vmem>>, vector<1x2x8x9xf32>
      %61 = vector.shape_cast %60 : vector<1x2x8x9xf32> to vector<2x8x9xf32>
      %62 = vector.shape_cast %58 : vector<2x8x9xf32> to vector<1x2x8x9xf32>
      tpu.vector_store %arg17[%59, %c0_52, %c0_53, %c0_54], %62 {strides = array<i32>} : memref<2x2x8x9xf32, #tpu.memory_space<vmem>>, vector<1x2x8x9xf32>,
      %c0_55 = arith.constant 0 : index
      %c0_56 = arith.constant 0 : index
      %c0_57 = arith.constant 0 : index
      %63 = vector.load %arg19[%c0_55, %c0_56, %c0_57] : memref<2x8x1xf32, #tpu.memory_space<vmem>>, vector<1x8x1xf32>
      %64 = vector.shape_cast %63 : vector<1x8x1xf32> to vector<8x1xf32>
      %cst_58 = arith.constant dense<0.000000e+00> : vector<2x8xf32>
      %65 = vector.multi_reduction <add>, %58, %cst_58 [2] : vector<2x8x9xf32> to vector<2x8xf32>
      %66 = vector.shape_cast %65 : vector<2x8xf32> to vector<2x8x1xf32>
      %cst_59 = arith.constant dense<0.000000e+00> : vector<8x1xf32>
      %67 = vector.multi_reduction <add>, %66, %cst_59 [0] : vector<2x8x1xf32> to vector<8x1xf32>
      %68 = arith.addf %64, %67 : vector<8x1xf32>
      %c0_60 = arith.constant 0 : index
      %c0_61 = arith.constant 0 : index
      %c0_62 = arith.constant 0 : index
      %69 = vector.load %arg19[%c0_60, %c0_61, %c0_62] : memref<2x8x1xf32, #tpu.memory_space<vmem>>, vector<1x8x1xf32>
      %70 = vector.shape_cast %69 : vector<1x8x1xf32> to vector<8x1xf32>
      %71 = vector.shape_cast %68 : vector<8x1xf32> to vector<1x8x1xf32>
      tpu.vector_store %arg19[%c0_60, %c0_61, %c0_62], %71 {strides = array<i32>} : memref<2x8x1xf32, #tpu.memory_space<vmem>>, vector<1x8x1xf32>,
      %c1_63 = arith.constant 1 : index
      %c0_64 = arith.constant 0 : index
      %c0_65 = arith.constant 0 : index
      %72 = vector.load %arg19[%c1_63, %c0_64, %c0_65] : memref<2x8x1xf32, #tpu.memory_space<vmem>>, vector<1x8x1xf32>
      %73 = vector.shape_cast %72 : vector<1x8x1xf32> to vector<8x1xf32>
      %74 = arith.mulf %58, %58 : vector<2x8x9xf32>
      %cst_66 = arith.constant dense<0.000000e+00> : vector<2x8xf32>
      %75 = vector.multi_reduction <add>, %74, %cst_66 [2] : vector<2x8x9xf32> to vector<2x8xf32>
      %76 = vector.shape_cast %75 : vector<2x8xf32> to vector<2x8x1xf32>
      %cst_67 = arith.constant dense<0.000000e+00> : vector<8x1xf32>
      %77 = vector.multi_reduction <add>, %76, %cst_67 [0] : vector<2x8x1xf32> to vector<8x1xf32>
      %78 = arith.addf %73, %77 : vector<8x1xf32>
      %c1_68 = arith.constant 1 : index
      %c0_69 = arith.constant 0 : index
      %c0_70 = arith.constant 0 : index
      %79 = vector.load %arg19[%c1_68, %c0_69, %c0_70] : memref<2x8x1xf32, #tpu.memory_space<vmem>>, vector<1x8x1xf32>
      %80 = vector.shape_cast %79 : vector<1x8x1xf32> to vector<8x1xf32>
      %81 = vector.shape_cast %78 : vector<8x1xf32> to vector<1x8x1xf32>
      tpu.vector_store %arg19[%c1_68, %c0_69, %c0_70], %81 {strides = array<i32>} : memref<2x8x1xf32, #tpu.memory_space<vmem>>, vector<1x8x1xf32>,
      %c0_71 = arith.constant 0 : index
      %c0_72 = arith.constant 0 : index
      %82 = vector.load %arg11[%c0_71, %c0_72] : memref<4x8xf32, #tpu.memory_space<vmem>>, vector<4x8xf32>
      %cst_73 = arith.constant dense<0.000000e+00> : vector<34x8xf32>
      %83 = tpu.matmul %16, %82, %cst_73 {dimension_numbers = #tpu.dot_dimension_numbers<[1], [0], [0], [1], [0, 0, 1, 1], [], []>} : vector<34x4xf32>, vector<4x8xf32>, vector<34x8xf32> -> vector<34x8xf32>
      %c0_74 = arith.constant 0 : index
      %c0_75 = arith.constant 0 : index
      %84 = vector.load %arg12[%c0_74, %c0_75] : memref<1x8xf32, #tpu.memory_space<vmem>>, vector<1x8xf32>
      %85 = vector.broadcast %84 : vector<1x8xf32> to vector<34x8xf32>
      %86 = arith.addf %83, %85 : vector<34x8xf32>
      %c0_76 = arith.constant 0 : index
      %c0_77 = arith.constant 0 : index
      %87 = vector.load %arg16[%c0_76, %c0_77] : memref<34x8xf32, #tpu.memory_space<vmem>>, vector<34x8xf32>
      tpu.vector_store %arg16[%c0_76, %c0_77], %86 {strides = array<i32>} : memref<34x8xf32, #tpu.memory_space<vmem>>, vector<34x8xf32>,
      %c0_78 = arith.constant 0 : index
      %c0_79 = arith.constant 0 : index
      %88 = tpu.strided_load %arg16[%c0_78, %c0_79] {strides = array<i32: 2, 1>} : memref<34x8xf32, #tpu.memory_space<vmem>>, vector<9x8xf32>
      %89 = vector.shape_cast %88 : vector<9x8xf32> to vector<1x9x8xf32>
      %c17 = arith.constant 17 : index
      %c0_80 = arith.constant 0 : index
      %90 = tpu.strided_load %arg16[%c17, %c0_80] {strides = array<i32: 2, 1>} : memref<34x8xf32, #tpu.memory_space<vmem>>, vector<9x8xf32>
      %91 = vector.shape_cast %90 : vector<9x8xf32> to vector<1x9x8xf32>
      %92 = tpu.concatenate %89, %91 in 0 : vector<1x9x8xf32>, vector<1x9x8xf32> -> vector<2x9x8xf32>
      %93 = tpu.transpose %92, [0, 2, 1] : vector<2x9x8xf32> -> vector<2x8x9xf32>
      %94 = arith.index_cast %arg1 : i32 to index
      %c0_81 = arith.constant 0 : index
      %c0_82 = arith.constant 0 : index
      %c0_83 = arith.constant 0 : index
      %95 = vector.load %arg18[%94, %c0_81, %c0_82, %c0_83] : memref<2x2x8x9xf32, #tpu.memory_space<vmem>>, vector<1x2x8x9xf32>
      %96 = vector.shape_cast %95 : vector<1x2x8x9xf32> to vector<2x8x9xf32>
      %97 = vector.shape_cast %93 : vector<2x8x9xf32> to vector<1x2x8x9xf32>
      tpu.vector_store %arg18[%94, %c0_81, %c0_82, %c0_83], %97 {strides = array<i32>} : memref<2x2x8x9xf32, #tpu.memory_space<vmem>>, vector<1x2x8x9xf32>,
    } else {
    }
    %c1_i32 = arith.constant 1 : i32
    %3 = arith.cmpi eq, %arg0, %c1_i32 : i32
    %c0_i32_1 = arith.constant 0 : i32
    %4 = arith.cmpi eq, %arg1, %c0_i32_1 : i32
    %5 = arith.andi %3, %4 : i1
    %6 = arith.extui %5 : i1 to i32
    %c0_i32_2 = arith.constant 0 : i32
    %7 = arith.cmpi ne, %6, %c0_i32_2 : i32
    scf.if %7 {
      %c0 = arith.constant 0 : index
      %c0_5 = arith.constant 0 : index
      %c0_6 = arith.constant 0 : index
      %11 = vector.load %arg19[%c0, %c0_5, %c0_6] : memref<2x8x1xf32, #tpu.memory_space<vmem>>, vector<1x8x1xf32>
      %12 = vector.shape_cast %11 : vector<1x8x1xf32> to vector<8x1xf32>
      %cst = arith.constant 0.027777778 : f32
      %13 = vector.broadcast %cst : f32 to vector<8x1xf32>
      %14 = arith.mulf %12, %13 : vector<8x1xf32>
      %c1 = arith.constant 1 : index
      %c0_7 = arith.constant 0 : index
      %c0_8 = arith.constant 0 : index
      %15 = vector.load %arg19[%c1, %c0_7, %c0_8] : memref<2x8x1xf32, #tpu.memory_space<vmem>>, vector<1x8x1xf32>
      %16 = vector.shape_cast %15 : vector<1x8x1xf32> to vector<8x1xf32>
      %cst_9 = arith.constant 0.027777778 : f32
      %17 = vector.broadcast %cst_9 : f32 to vector<8x1xf32>
      %18 = arith.mulf %16, %17 : vector<8x1xf32>
      %19 = arith.mulf %14, %14 : vector<8x1xf32>
      %20 = arith.subf %18, %19 : vector<8x1xf32>
      %cst_10 = arith.constant 0.000000e+00 : f32
      %21 = vector.broadcast %cst_10 : f32 to vector<8x1xf32>
      %22 = arith.maximumf %20, %21 : vector<8x1xf32>
      %cst_11 = arith.constant 9.99999974E-6 : f32
      %23 = vector.broadcast %cst_11 : f32 to vector<8x1xf32>
      %24 = arith.addf %22, %23 : vector<8x1xf32>
      %25 = math.rsqrt %24 : vector<8x1xf32>
      %c0_12 = arith.constant 0 : index
      %c0_13 = arith.constant 0 : index
      %26 = vector.load %arg9[%c0_12, %c0_13] : memref<8x1xf32, #tpu.memory_space<vmem>>, vector<8x1xf32>
      %27 = arith.mulf %26, %25 : vector<8x1xf32>
      %c0_14 = arith.constant 0 : index
      %c0_15 = arith.constant 0 : index
      %c0_16 = arith.constant 0 : index
      %28 = vector.load %arg20[%c0_14, %c0_15, %c0_16] : memref<2x8x1xf32, #tpu.memory_space<vmem>>, vector<1x8x1xf32>
      %29 = vector.shape_cast %28 : vector<1x8x1xf32> to vector<8x1xf32>
      %30 = vector.shape_cast %27 : vector<8x1xf32> to vector<1x8x1xf32>
      tpu.vector_store %arg20[%c0_14, %c0_15, %c0_16], %30 {strides = array<i32>} : memref<2x8x1xf32, #tpu.memory_space<vmem>>, vector<1x8x1xf32>,
      %c0_17 = arith.constant 0 : index
      %c0_18 = arith.constant 0 : index
      %31 = vector.load %arg10[%c0_17, %c0_18] : memref<8x1xf32, #tpu.memory_space<vmem>>, vector<8x1xf32>
      %32 = arith.mulf %14, %27 : vector<8x1xf32>
      %33 = arith.subf %31, %32 : vector<8x1xf32>
      %c1_19 = arith.constant 1 : index
      %c0_20 = arith.constant 0 : index
      %c0_21 = arith.constant 0 : index
      %34 = vector.load %arg20[%c1_19, %c0_20, %c0_21] : memref<2x8x1xf32, #tpu.memory_space<vmem>>, vector<1x8x1xf32>
      %35 = vector.shape_cast %34 : vector<1x8x1xf32> to vector<8x1xf32>
      %36 = vector.shape_cast %33 : vector<8x1xf32> to vector<1x8x1xf32>
      tpu.vector_store %arg20[%c1_19, %c0_20, %c0_21], %36 {strides = array<i32>} : memref<2x8x1xf32, #tpu.memory_space<vmem>>, vector<1x8x1xf32>,
    } else {
    }
    %c1_i32_3 = arith.constant 1 : i32
    %8 = arith.cmpi eq, %arg0, %c1_i32_3 : i32
    %9 = arith.extui %8 : i1 to i32
    %c0_i32_4 = arith.constant 0 : i32
    %10 = arith.cmpi ne, %9, %c0_i32_4 : i32
    scf.if %10 {
      %11 = arith.index_cast %arg1 : i32 to index
      %c0 = arith.constant 0 : index
      %c0_5 = arith.constant 0 : index
      %c0_6 = arith.constant 0 : index
      %12 = vector.load %arg17[%11, %c0, %c0_5, %c0_6] : memref<2x2x8x9xf32, #tpu.memory_space<vmem>>, vector<1x2x8x9xf32>
      %13 = vector.shape_cast %12 : vector<1x2x8x9xf32> to vector<2x8x9xf32>
      %c0_7 = arith.constant 0 : index
      %c0_8 = arith.constant 0 : index
      %c0_9 = arith.constant 0 : index
      %14 = vector.load %arg20[%c0_7, %c0_8, %c0_9] : memref<2x8x1xf32, #tpu.memory_space<vmem>>, vector<1x8x1xf32>
      %15 = vector.shape_cast %14 : vector<1x8x1xf32> to vector<8x1xf32>
      %16 = vector.shape_cast %15 : vector<8x1xf32> to vector<1x8x1xf32>
      %17 = vector.broadcast %16 : vector<1x8x1xf32> to vector<2x8x9xf32>
      %18 = arith.mulf %13, %17 : vector<2x8x9xf32>
      %c1 = arith.constant 1 : index
      %c0_10 = arith.constant 0 : index
      %c0_11 = arith.constant 0 : index
      %19 = vector.load %arg20[%c1, %c0_10, %c0_11] : memref<2x8x1xf32, #tpu.memory_space<vmem>>, vector<1x8x1xf32>
      %20 = vector.shape_cast %19 : vector<1x8x1xf32> to vector<8x1xf32>
      %21 = vector.shape_cast %20 : vector<8x1xf32> to vector<1x8x1xf32>
      %22 = vector.broadcast %21 : vector<1x8x1xf32> to vector<2x8x9xf32>
      %23 = arith.addf %18, %22 : vector<2x8x9xf32>
      %24 = arith.index_cast %arg1 : i32 to index
      %c0_12 = arith.constant 0 : index
      %c0_13 = arith.constant 0 : index
      %c0_14 = arith.constant 0 : index
      %25 = vector.load %arg18[%24, %c0_12, %c0_13, %c0_14] : memref<2x2x8x9xf32, #tpu.memory_space<vmem>>, vector<1x2x8x9xf32>
      %26 = vector.shape_cast %25 : vector<1x2x8x9xf32> to vector<2x8x9xf32>
      %27 = arith.addf %23, %26 : vector<2x8x9xf32>
      %cst = arith.constant 0.000000e+00 : f32
      %28 = vector.broadcast %cst : f32 to vector<2x8x9xf32>
      %29 = arith.maximumf %27, %28 : vector<2x8x9xf32>
      %c0_15 = arith.constant 0 : index
      %c0_16 = arith.constant 0 : index
      %c0_17 = arith.constant 0 : index
      %30 = vector.load %arg13[%c0_15, %c0_16, %c0_17] : memref<2x8x9xf32, #tpu.memory_space<vmem>>, vector<2x8x9xf32>
      tpu.vector_store %arg13[%c0_15, %c0_16, %c0_17], %29 {strides = array<i32>} : memref<2x8x9xf32, #tpu.memory_space<vmem>>, vector<2x8x9xf32>,
    } else {
    }
    return
  }
  func.func @transform_0(%arg0: i32, %arg1: i32) -> (i32, i32, i32) {
    %c1_i32 = arith.constant 1 : i32
    %0 = arith.subi %c1_i32, %arg0 : i32
    %1 = arith.muli %arg1, %0 : i32
    %c0_i32 = arith.constant 0 : i32
    %c0_i32_0 = arith.constant 0 : i32
    %c0_i32_1 = arith.constant 0 : i32
    return %1, %c0_i32, %c0_i32_0 : i32, i32, i32
  }
  func.func @transform_1(%arg0: i32, %arg1: i32) -> (i32, i32) {
    %c0_i32 = arith.constant 0 : i32
    %c0_i32_0 = arith.constant 0 : i32
    %c0_i32_1 = arith.constant 0 : i32
    return %c0_i32, %c0_i32_0 : i32, i32
  }
  func.func @transform_2(%arg0: i32, %arg1: i32) -> (i32, i32) {
    %c0_i32 = arith.constant 0 : i32
    %c0_i32_0 = arith.constant 0 : i32
    %c0_i32_1 = arith.constant 0 : i32
    return %c0_i32, %c0_i32_0 : i32, i32
  }
  func.func @transform_3(%arg0: i32, %arg1: i32) -> (i32, i32) {
    %c0_i32 = arith.constant 0 : i32
    %c0_i32_0 = arith.constant 0 : i32
    %c0_i32_1 = arith.constant 0 : i32
    return %c0_i32, %c0_i32_0 : i32, i32
  }
  func.func @transform_4(%arg0: i32, %arg1: i32) -> (i32, i32) {
    %c0_i32 = arith.constant 0 : i32
    %c0_i32_0 = arith.constant 0 : i32
    %c0_i32_1 = arith.constant 0 : i32
    return %c0_i32, %c0_i32_0 : i32, i32
  }
  func.func @transform_5(%arg0: i32, %arg1: i32) -> (i32, i32) {
    %c0_i32 = arith.constant 0 : i32
    %c0_i32_0 = arith.constant 0 : i32
    %c0_i32_1 = arith.constant 0 : i32
    return %c0_i32, %c0_i32_0 : i32, i32
  }
  func.func @transform_6(%arg0: i32, %arg1: i32) -> (i32, i32) {
    %c0_i32 = arith.constant 0 : i32
    %c0_i32_0 = arith.constant 0 : i32
    %c0_i32_1 = arith.constant 0 : i32
    return %c0_i32, %c0_i32_0 : i32, i32
  }
  func.func @transform_7(%arg0: i32, %arg1: i32) -> (i32, i32) {
    %c0_i32 = arith.constant 0 : i32
    %c0_i32_0 = arith.constant 0 : i32
    %c0_i32_1 = arith.constant 0 : i32
    return %c0_i32, %c0_i32_0 : i32, i32
  }
  func.func @transform_8(%arg0: i32, %arg1: i32) -> (i32, i32) {
    %c0_i32 = arith.constant 0 : i32
    %c0_i32_0 = arith.constant 0 : i32
    %c0_i32_1 = arith.constant 0 : i32
    return %c0_i32, %c0_i32_0 : i32, i32
  }
  func.func @transform_9(%arg0: i32, %arg1: i32) -> (i32, i32) {
    %c0_i32 = arith.constant 0 : i32
    %c0_i32_0 = arith.constant 0 : i32
    %c0_i32_1 = arith.constant 0 : i32
    return %c0_i32, %c0_i32_0 : i32, i32
  }
  func.func @transform_10(%arg0: i32, %arg1: i32) -> (i32, i32) {
    %c0_i32 = arith.constant 0 : i32
    %c0_i32_0 = arith.constant 0 : i32
    %c0_i32_1 = arith.constant 0 : i32
    return %c0_i32, %c0_i32_0 : i32, i32
  }
  func.func @transform_11(%arg0: i32, %arg1: i32) -> (i32, i32, i32) {
    %0 = arith.muli %arg1, %arg0 : i32
    %c0_i32 = arith.constant 0 : i32
    %c0_i32_0 = arith.constant 0 : i32
    %c0_i32_1 = arith.constant 0 : i32
    return %0, %c0_i32, %c0_i32_0 : i32, i32, i32
  }
}

</mosaic_0001>

<bundles_post_ra>
// kernel: tpu_custom_call.1
= control target key start
LH: loop header
LB: loop body
LE: loop exit
PB: predicated region body
PF: predicated region fallthrough
CT: control target
= control target key end

     0   :  { %16 = vsyncpa [#allocation10], 0  ;;  %s2898_s0 = inlined_call_operand.vmem [shape: f32[4,4,17], index: 0, kind: input, shape index: {}]   ;;  %s2899_s1 = inlined_call_operand.vmem [shape: f32[4,16], index: 1, kind: input, shape index: {}]   ;;  %s2900_s2 = inlined_call_operand.vmem [shape: f32[1,16], index: 2, kind: input, shape index: {}]   ;;  %s2901_s3 = inlined_call_operand.vmem [shape: f32[64,16], index: 3, kind: input, shape index: {}]   ;;  %s2902_s4 = inlined_call_operand.vmem [shape: f32[1,16], index: 4, kind: input, shape index: {}]   ;;  %s2903_s5 = inlined_call_operand.vmem [shape: f32[16,8], index: 5, kind: input, shape index: {}]   ;;  %s2904_s6 = inlined_call_operand.vmem [shape: f32[1,8], index: 6, kind: input, shape index: {}]   ;;  %s2905_s7 = inlined_call_operand.vmem [shape: f32[8,1], index: 7, kind: input, shape index: {}]   ;;  %s2906_s8 = inlined_call_operand.vmem [shape: f32[8,1], index: 8, kind: input, shape index: {}]   ;;  %s2907_s9 = inlined_call_operand.vmem [shape: f32[4,8], index: 9, kind: input, shape index: {}]   ;;  %s2908_s10 = inlined_call_operand.vmem [shape: f32[1,8], index: 10, kind: input, shape index: {}]   ;;  %s2909_s11 = inlined_call_operand.hbm [shape: f32[4,8,9], index: 11, kind: output, shape index: {}]  }
   0x1   :  { %18 = vsyncpa [#allocation10 + $0x1], 0  ;;  %s2476_s17 = smov 0   ;;  %s2478_s18 = smov 0  }
   0x2   :  { %s2480_s19 = smov 0   ;;  %s2482_s20 = smov 0  }
   0x3   :  { %s2484_s21 = smov 0   ;;  %s2486_s22 = smov 0  }
   0x4   :  { %s2488_s23 = smov 0   ;;  %s2490_s24 = smov 0  }
   0x5 LB: > { %2915 = sst [smem:[#allocation12_spill]] %s2375_s17  ;;  %s2064_s25 = sadd.s32 4294967295, %s2403_s24   ;;  %s2403_s24 = sphi %s2490_s24, %s24_s24   ;;  %s2399_s23 = sphi %s2488_s23, %s2926_s23   ;;  %s2395_s22 = sphi %s2486_s22, %s2925_s22   ;;  %s2391_s21 = sphi %s2484_s21, %s2924_s21   ;;  %s2387_s20 = sphi %s2482_s20, %s2923_s20   ;;  %s2383_s19 = sphi %s2480_s19, %s2929_s19   ;;  %s2379_s18 = sphi %s2478_s18, %s2928_s18   ;;  %s2375_s17 = sphi %s2476_s17, %s2927_s17  }
   0x6   : > { %2916 = sst [smem:[#allocation13_spill]] %s2395_s22  ;;  %s2065_s26 = sadd.s32 4294967294, %s2403_s24  }
   0x7   : > { %2917 = sst [smem:[#allocation14_spill]] %s2399_s23  ;;  %s33_s27 = sadd.s32 1, %s2395_s22 }
   0x8   : > { %p34_p0 = scmp.ge.s32.totalorder %s33_s27, 2  ;;  %s36_s28 = sadd.s32 1, %s2399_s23 }
   0x9   : > { %s280_s29 = smul.u32 %s2395_s22, %s2399_s23  ;;  %p295_p1 = scmp.ne.s32.totalorder %s2383_s19, %s2379_s18 }
   0xa   : > { %s2931_s27 = smov (%p34_p0, %s33_s27), 0  ;;  %s2933_s28 = smov (!%p34_p0, %s36_s28), %s2399_s23 }
   0xb   : > { %2918 = sst [smem:[#allocation15_spill]] %s2931_s27  ;;  %p296_p2 = scmp.eq.s32.totalorder %s2064_s25, 3 }
   0xc   : > { %p301_p3 = scmp.ne.s32.totalorder %s2379_s18, %s2375_s17  ;;  %p38_p4 = scmp.ge.s32.totalorder %s2933_s28, 2 }
   0xd   : > { %p302_p5 = scmp.eq.s32.totalorder %s2065_s26, 3  ;;  %p2529_p6 = por %p296_p2, %p295_p1 }
   0xe   : > { %p2068_p7 = scmp.ge.s32.totalorder %s2403_s24, 1  ;;  %s2935_s28 = smov (%p38_p4, %s2933_s28), 0 }
   0xf   : > { %2920 = sst [smem:[#allocation16_spill]] %s2935_s28  ;;  %p2536_p8 = por %p302_p5, %p301_p3 }
  0x10   : > { %p363_p9 = scmp.lt.s32.totalorder %s2403_s24, 5  ;;  %s281_s13 = smul.u32 %s2935_s28, %s2931_s27 }
  0x11   : > { %s285_s15 = sadd.s32 1, %s2383_s19 }
  0x12   : > { %p364_p10 = pnand %p2068_p7, %p363_p9  ;;  %s282_s14 = ssub.s32 %s280_s29, %s281_s13 }
  0x13   : > { %p283_p11 = scmp.eq.s32.totalorder %s282_s14, 0  ;;  %s402_s25 = sand.u32 (!%p364_p10), 1, %s2379_s18  }
  0x14   : > { %367 = sbr.rel (%p364_p10) target bundleno = 1486 (0x5ce), region = 64  ;;  %s405_s26 = ssub.s32 (!%p364_p10), 1, %s2391_s21 }
  0x15   : > { %s2545_s16 = scalar_select %p283_p11, %s2383_s19, %s285_s15  }
  0x16   : > { %s2069_s23 = sshll.u32 (!%p364_p10), %s402_s25, 4  ;;  %s406_s22 = smul.u32 (!%p364_p10), %s2387_s20, %s405_s26 }
  0x17   : > { %s2555_s14 = scalar_lea.vmem (!%p364_p10), [#allocation9], %s2069_s23  ;;  %p2072_p13 = scmp.ne.s32.totalorder (!%p364_p10), %s2391_s21, 0 }
  0x18   : > { %s2070_s17 = sshll.u32 (!%p364_p10), %s406_s22, 1 }
  0x19   : > { %p408_p12 = scmp.lt.s32.totalorder %s2070_s17, 3  ;;  %420 = sbr.rel (%p2072_p13) target bundleno = 1276 (0x4fc), region = 68 }
  0x1a   : > { %p2073_p0 = scmp.ne.s32.totalorder (!%p2072_p13), %s2387_s20, 0 }
  0x1b   : > { %s2937_s17 = smov (!%p408_p12, %s2070_s17), 3 }
  0x1c   : > { %s2071_s28 = sshll.u32 %s2937_s17, 2 }
  0x1d   : > { %s411_s13 = scalar_lea.vmem %s2898_s0, %s2071_s28 }
  0x1e   : > { %424 = sbr.rel (%p2073_p0) target bundleno = 41 (0x29), region = 72 }
  0x23   : > { %vm425_vm0 = vcmask 130048   ;;  %vm431_vm1 = vcmask 123904   ;;  %vm433_vm2 = vcmask 7168   ;;  %v2405_v0 = vmov 0.0  }
  0x24   : > { %426 = vst.msk [vmem:[#allocation2] sm:$0xff] %vm425_vm0, %v2405_v0  ;;  %427 = vst.msk [vmem:[#allocation2 + $0x8] sm:$0xff] %vm425_vm0, %v2405_v0 }
  0x25   : > { %428 = vst.msk [vmem:[#allocation2 + $0x10] sm:$0xff] %vm425_vm0, %v2405_v0  ;;  %429 = vst.msk [vmem:[#allocation2 + $0x18] sm:$0xff] %vm425_vm0, %v2405_v0 }
  0x26   : > { %430 = vst.msk [vmem:[#allocation2 + $0x20] sm:$0xff] %vm425_vm0, %v2405_v0 }
  0x27   : > { %432 = vst.msk [vmem:[#allocation2 + $0x28] sm:$0x3] %vm431_vm1, %v2405_v0 }
  0x28   : > { %434 = vst.msk [vmem:[#allocation7] sm:$0xff] %vm433_vm2, %v2405_v0  ;;  %435 = vst.msk [vmem:[#allocation7 + $0x8] sm:$0xff] %vm433_vm2, %v2405_v0 }
  0x29 PF: > { %v436_v1 = vld [vmem:[%s411_s13] sm:$0xf]  ;;  %v437_v2 = vld [vmem:[%s411_s13 + $0x4] sm:$0xf]  ;;  %v2406_v3 = vmov 0.0   ;;  %vm962_vm3 = vcmask 1043456   ;;  %v512_v7 = vlaneseq }
  0x2a   : > { %438 = vxpose.xlu0.b32.start.end [1/1] (short) (narrow) %v436_v1, 24  ;;  %2139 = vmatprep.subr.mxu0 %v2406_v3  ;;  %v732_v4 = vld [vmem:[%s2899_s1] sm:$0xf]  ;;  %vm2407_vm4 = vmmov 0   ;;  %v2408_v5 = vmov 1966171168  }
  0x2b   : > { %2211 = vmatprep.subr.mxu1 %v2406_v3  ;;  %2140 = vmatpush3.msk.msra.mxu0 %vm962_vm3, %v732_v4  ;;  %v510_v6 = vunpack.c.l.s4 %v2408_v5  ;;  %v513_v9 = vshrl.u32 %v512_v7, 7  ;;  %vm951_vm5 = vcmask 31744   ;;  %vm1061_vm6 = vcmask 130048   ;;  %s2409_s29 = smov 16   ;;  %s2410_s27 = smov 32  }
  0x2c   : > { %2141 = vmatprep.mubr.msk.f32.mxu0 %vm2407_vm4, %v2406_v3  ;;  %2156 = vmatprep.subr.mxu0 %v2406_v3  ;;  %vm1064_vm7 = vcmask 122880   ;;  %vm1066_vm8 = vcmask 130049   ;;  %vm1069_vm9 = vcmask 123904   ;;  %s2411_s28 = smov 48   ;;  %vm1088_vm10 = vcmask 261248   ;;  %s2095_s13 = sshll.u32 %s2387_s20, 4 }
  0x2d   : > { %2178 = vmatprep.mubr.msk.f32.mxu1 %vm2407_vm4, %v2406_v3  ;;  %v511_v8 = vunpack.c.0.s8 %v510_v6  ;;  %vm1104_vm11 = vcmask 392448   ;;  %vm1120_vm12 = vcmask 523648   ;;  %vm1090_vm13 = vcmask 254080   ;;  %s1699_s17 = scalar_lea.vmem [#allocation5], %s2095_s13  ;;  %s1906_s22 = scalar_lea.vmem [#allocation6], %s2095_s13 }
  0x2e   : > { %vm1106_vm14 = vcmask 385280   ;;  %vm1190_vm15 = vcmask 523264   ;;  %vm1122_vm0 = vcmask 516480   ;;  %vm1828_vm1 = vcmask 64512  }
  0x2f   : > { %v2570_v10 = vsub.s32 %v511_v8, %v513_v9  ;;  %vm1833_vm2 = vcmask 58368  }
  0x33   : > { %470 = vxpose.xlu0.b32.start.end [1/1] (short) (narrow) %v437_v2, 24 }
  0xa6   : > { %v454_v11 = vpop.trf.xlu0 }
  0xa7   : > { %v508_v12 = vcombine.high %v454_v11, %v454_v11  ;;  %v515_v13 = vrot.slane %v454_v11, %v2570_v10 }
  0xa9   : > { %v522_v14 = vrot.slane %v508_v12, %v2570_v10  ;;  %v523_v15 = vcombine.high %v515_v13, %v515_v13  ;;  %v531_v18 = vrot.slane %v515_v13, %v2570_v10 }
  0xaa   : > { %v455_v16 = vpop.trf.xlu0 }
  0xab   : > { %v524_v17 = vcombine.high %v522_v14, %v522_v14  ;;  %v545_v19 = vrot.slane %v523_v15, %v2570_v10  ;;  %v557_v20 = vcombine.high %v455_v16, %v455_v16  ;;  %v538_v21 = vrot.slane %v522_v14, %v2570_v10 }
  0xac   : > { %v564_v22 = vrot.slane %v455_v16, %v2570_v10 }
  0xad   : > { %v552_v23 = vrot.slane %v524_v17, %v2570_v10  ;;  %v740_v24 = vcombine.low %v531_v18, %v545_v19  ;;  %v2075_v25 = vcombine.high %v531_v18, %v545_v19  ;;  %v571_v26 = vrot.slane %v557_v20, %v2570_v10 }
  0xae   : > { %v572_v27 = vcombine.high %v564_v22, %v564_v22  ;;  %v456_v28 = vpop.trf.xlu0  ;;  %v580_v34 = vrot.slane %v564_v22, %v2570_v10 }
  0xaf   : > { %v742_v29 = vcombine.low %v538_v21, %v552_v23  ;;  %v2076_v30 = vcombine.high %v538_v21, %v552_v23  ;;  %v750_v31 = vrot.slane %v740_v24, %v2570_v10  ;;  %v757_v32 = vrot.slane %v2075_v25, %v2570_v10 }
  0xb0   : > { %v573_v33 = vcombine.high %v571_v26, %v571_v26  ;;  %v594_v35 = vrot.slane %v572_v27, %v2570_v10  ;;  %v612_v36 = vrot.slane %v456_v28, %v2570_v10  ;;  %v587_v39 = vrot.slane %v571_v26, %v2570_v10 }
  0xb1   : > { %v764_v37 = vrot.slane %v742_v29, %v2570_v10  ;;  %v771_v38 = vrot.slane %v2076_v30, %v2570_v10  ;;  %v772_v40 = vcombine.low %v750_v31, %v757_v32 }
  0xb2   : > { %v601_v41 = vrot.slane %v573_v33, %v2570_v10  ;;  %v789_v42 = vcombine.low %v580_v34, %v594_v35  ;;  %v2077_v43 = vcombine.high %v580_v34, %v594_v35  ;;  %v486_v44 = vpop.trf.xlu0  ;;  %v619_v45 = vrot.slane %v612_v36, %v2570_v10 }
  0xb3   : > { %v620_v46 = vcombine.high %v486_v44, %v486_v44  ;;  %v627_v47 = vrot.slane %v486_v44, %v2570_v10  ;;  %v773_v48 = vcombine.low %v764_v37, %v771_v38  ;;  %v780_v61 = vrot.slane %v772_v40, %v2570_v10 }
  0xb4   : > { %v791_v49 = vcombine.low %v587_v39, %v601_v41  ;;  %v2078_v50 = vcombine.high %v587_v39, %v601_v41  ;;  %v799_v51 = vrot.slane %v789_v42, %v2570_v10  ;;  %v806_v52 = vrot.slane %v2077_v43, %v2570_v10 }
  0xb5   : > { %v634_v53 = vrot.slane %v620_v46, %v2570_v10  ;;  %v635_v54 = vcombine.high %v627_v47, %v627_v47  ;;  %v643_v55 = vrot.slane %v627_v47, %v2570_v10  ;;  %v787_v56 = vrot.slane %v773_v48, %v2570_v10 }
  0xb6   : > { %v813_v57 = vrot.slane %v791_v49, %v2570_v10  ;;  %v820_v58 = vrot.slane %v2078_v50, %v2570_v10  ;;  %v821_v59 = vcombine.low %v799_v51, %v806_v52  ;;  %v487_v60 = vpop.trf.xlu0 }
  0xb7   : > { %v636_v62 = vcombine.high %v634_v53, %v634_v53  ;;  %v650_v63 = vrot.slane %v634_v53, %v2570_v10  ;;  %v657_v0 = vrot.slane %v635_v54, %v2570_v10  ;;  %v665_v1 = vcombine.high %v643_v55, %v643_v55 }
  0xb8   : > { %v838_v2 = vcombine.low %v619_v45, %v643_v55  ;;  %v669_v4 = vcombine.high %v487_v60, %v487_v60  ;;  %v676_v5 = vrot.slane %v487_v60, %v2570_v10  ;;  %v2602_v6 = vcombine.low %v780_v61, %v787_v56 }
  0xb9   : > { %v664_v7 = vrot.slane %v636_v62, %v2570_v10  ;;  %v666_v8 = vcombine.high %v650_v63, %v650_v63  ;;  %v667_v9 = vcombine.high %v657_v0, %v657_v0  ;;  %v839_v11 = vcombine.low %v657_v0, %v665_v1  ;;  %v1182_v0 = vld [vmem:[%s2901_s3 + $0x38] sm:$0xff]  ;;  %v1181_v1 = vld [vmem:[%s2901_s3 + $0x30] sm:$0xff] }
  0xba   : > { %v848_v12 = vrot.slane %v838_v2, %v2570_v10  ;;  %v683_v13 = vrot.slane %v669_v4, %v2570_v10  ;;  %v684_v14 = vcombine.high %v676_v5, %v676_v5  ;;  %v692_v15 = vrot.slane %v676_v5, %v2570_v10  ;;  %2142 = vmatmul.mubr.msk.f32.vlgmr.msra.gmra.mxu0 %vm951_vm5, %v2602_v6  ;;  %v488_v24 = vpop.trf.xlu0 }
  0xbb   : > { %v840_v16 = vcombine.low %v667_v9, %v650_v63  ;;  %v841_v17 = vcombine.low %v664_v7, %v666_v8  ;;  %v855_v18 = vrot.slane %v839_v11, %v2570_v10  ;;  %v668_v19 = vcombine.high %v664_v7, %v664_v7  ;;  %2144 = vmatprep.mubr.msk.f32.mxu0 %vm2407_vm4, %v2406_v3  ;;  %v1180_v8 = vld [vmem:[%s2901_s3 + $0x28] sm:$0xff]  ;;  %v1179_v9 = vld [vmem:[%s2901_s3 + $0x20] sm:$0xff] }
  0xbc   : > { %v685_v20 = vcombine.high %v683_v13, %v683_v13  ;;  %v699_v21 = vrot.slane %v683_v13, %v2570_v10  ;;  %v706_v22 = vrot.slane %v684_v14, %v2570_v10  ;;  %v714_v23 = vcombine.high %v692_v15, %v692_v15  ;;  %2157 = vmatpush3.msra.mxu0 %v1182_v0 }
  0xbd   : > { %v862_v25 = vrot.slane %v840_v16, %v2570_v10  ;;  %v869_v26 = vrot.slane %v841_v17, %v2570_v10  ;;  %v870_v27 = vcombine.low %v848_v12, %v855_v18  ;;  %v887_v28 = vcombine.low %v668_v19, %v692_v15  ;;  %2219 = vmatpush3.msra.mxu1 %v1182_v0  ;;  %v1178_v15 = vld [vmem:[%s2901_s3 + $0x18] sm:$0xff]  ;;  %v1177_v16 = vld [vmem:[%s2901_s3 + $0x10] sm:$0xff] }
  0xbe   : > { %v713_v29 = vrot.slane %v685_v20, %v2570_v10  ;;  %v715_v30 = vcombine.high %v699_v21, %v699_v21  ;;  %v716_v31 = vcombine.high %v706_v22, %v706_v22  ;;  %v888_v32 = vcombine.low %v706_v22, %v714_v23  ;;  %2158 = vmatprep.subr.mxu0 %v2406_v3 }
  0xbf   : > { %v897_v33 = vrot.slane %v887_v28, %v2570_v10  ;;  %v822_v34 = vcombine.low %v813_v57, %v820_v58  ;;  %v829_v35 = vrot.slane %v821_v59, %v2570_v10  ;;  %v724_v36 = vrot.slane %v488_v24, %v2570_v10  ;;  %v2074_v58 = vld [vmem:[%s2900_s2] ss:$0 sm:$0xff]  ;;  %2212 = vmatprep.subr.mxu1 %v2406_v3  ;;  %v1176_v24 = vld [vmem:[%s2901_s3 + $0x8] sm:$0xff] }
  0xc0   : > { %v889_v37 = vcombine.low %v716_v31, %v699_v21  ;;  %v890_v38 = vcombine.low %v713_v29, %v715_v30  ;;  %v904_v39 = vrot.slane %v888_v32, %v2570_v10  ;;  %v717_v40 = vcombine.high %v713_v29, %v713_v29  ;;  %2159 = vmatpush3.msra.mxu0 %v1181_v1 }
  0xc1   : > { %v836_v41 = vrot.slane %v822_v34, %v2570_v10  ;;  %v731_v42 = vrot.slane %v724_v36, %v2570_v10  ;;  %v871_v43 = vcombine.low %v862_v25, %v869_v26  ;;  %v878_v44 = vrot.slane %v870_v27, %v2570_v10  ;;  %2220 = vmatpush3.msra.mxu1 %v1181_v1  ;;  %v1175_v27 = vld [vmem:[%s2901_s3] sm:$0xff]  ;;  %v1111_v36 = vld [vmem:[#allocation2 + $0x13] ss:$2 sm:$0x1] }
  0xc2   : > { %v911_v45 = vrot.slane %v889_v37, %v2570_v10  ;;  %v918_v46 = vrot.slane %v890_v38, %v2570_v10  ;;  %v919_v47 = vcombine.low %v897_v33, %v904_v39  ;;  %2160 = vmatprep.subr.mxu0 %v2406_v3  ;;  %2213 = vmatprep.subr.mxu1 %v2406_v3 }
  0xc3   : > { %v2627_v48 = vcombine.low %v829_v35, %v836_v41  ;;  %v885_v49 = vrot.slane %v871_v43, %v2570_v10  ;;  %v936_v51 = vcombine.low %v717_v40, %v731_v42  ;;  %2161 = vmatpush3.msra.mxu0 %v1180_v8  ;;  %2221 = vmatpush3.msra.mxu1 %v1180_v8  ;;  %v1161_v41 = vld [vmem:[#allocation2 + $0x28] ss:$2 sm:$0x1] }
  0xc4   : > { %v920_v50 = vcombine.low %v911_v45, %v918_v46  ;;  %v927_v53 = vrot.slane %v919_v47, %v2570_v10  ;;  %2162 = vmatprep.subr.mxu0 %v2406_v3  ;;  %2214 = vmatprep.subr.mxu1 %v2406_v3 }
  0xc5   : > { %2145 = vmatmul.mubr.msk.f32.gmra.mxu0 %vm951_vm5, %v2627_v48  ;;  %v2632_v52 = vcombine.low %v878_v44, %v885_v49  ;;  %v943_v55 = vrot.slane %v936_v51, %v2570_v10  ;;  %2222 = vmatpush3.msra.mxu1 %v1179_v9 }
  0xc6   : > { %2147 = vmatprep.mubr.msk.f32.mxu0 %vm2407_vm4, %v2406_v3  ;;  %v934_v54 = vrot.slane %v920_v50, %v2570_v10  ;;  %2163 = vmatpush3.msra.mxu0 %v1179_v9  ;;  %v2096_v9 = vld [vmem:[%s2908_s10] ss:$0 sm:$0xff] }
  0xc7   : > { %v2648_v57 = vrot.slane %v943_v55, %v2570_v10  ;;  %2164 = vmatprep.subr.mxu0 %v2406_v3  ;;  %2215 = vmatprep.subr.mxu1 %v2406_v3 }
  0xc8   : > { %v2641_v56 = vcombine.low %v927_v53, %v934_v54  ;;  %2165 = vmatpush3.msra.mxu0 %v1178_v15  ;;  %2223 = vmatpush3.msra.mxu1 %v1178_v15 }
  0xc9   : > { %2148 = vmatmul.mubr.msk.f32.gmra.mxu0 %vm951_vm5, %v2632_v52  ;;  %2166 = vmatprep.subr.mxu0 %v2406_v3 }
  0xca   : > { %2150 = vmatprep.mubr.msk.f32.mxu0 %vm2407_vm4, %v2406_v3  ;;  %2216 = vmatprep.subr.mxu1 %v2406_v3 }
  0xcb   : > { %2167 = vmatpush3.msra.mxu0 %v1177_v16  ;;  %2224 = vmatpush3.msra.mxu1 %v1177_v16 }
  0xcc   : > { %2168 = vmatprep.subr.mxu0 %v2406_v3  ;;  %2217 = vmatprep.subr.mxu1 %v2406_v3 }
  0xcd   : > { %2151 = vmatmul.mubr.msk.f32.gmra.mxu0 %vm951_vm5, %v2641_v56  ;;  %2225 = vmatpush3.msra.mxu1 %v1176_v24 }
  0xce   : > { %2153 = vmatprep.mubr.msk.f32.mxu0 %vm2407_vm4, %v2406_v3  ;;  %2169 = vmatpush3.msra.mxu0 %v1176_v24 }
  0xcf   : > { %2170 = vmatprep.subr.mxu0 %v2406_v3  ;;  %2218 = vmatprep.subr.mxu1 %v2406_v3 }
  0xd0   : > { %2171 = vmatpush3.msra.mxu0 %v1175_v27  ;;  %2226 = vmatpush3.msra.mxu1 %v1175_v27 }
  0xd1   : > { %2154 = vmatmul.mubr.msk.f32.gmra.mxu0 %vm951_vm5, %v2648_v57  ;;  %2194 = vmatprep.subr.mxu1 %v2406_v3 }
  0xd2   : > { %2172 = vmatprep.mubr.msk.f32.mxu0 %vm2407_vm4, %v2406_v3  ;;  %2181 = vmatprep.subr.mxu0 %v2406_v3 }
 0x17a   : > { %v1032_v59 = vpop.f32.mrf.mxu0 }
 0x17b   : > { %v1033_v60 = vadd.f32 %v2074_v58, %v1032_v59 }
 0x17c   : > { %v2143_v61 = vpop.f32.mrf.mxu0 }
 0x17d   : > { %v1056_v62 = vmax.f32 %v1033_v60, 0.0  ;;  %v1727_v60 = vld [vmem:[%s2907_s9] sm:$0xf] }
 0x17f   : > { %1062 = vst.msk [vmem:[#allocation2 + $0x2] sm:$0xff] %vm1061_vm6, %v1056_v62 }
 0x185   : > { %v1037_v63 = vpop.f32.mrf.mxu0 }
 0x186   : > { %v1038_v2 = vadd.f32 %v2074_v58, %v1037_v63 }
 0x187   : > { %v2146_v4 = vpop.f32.mrf.mxu0 }
 0x188   : > { %v1057_v5 = vmax.f32 %v1038_v2, 0.0 }
 0x189   : > { %v1042_v7 = vpop.f32.mrf.mxu0 }
 0x18a   : > { %1063 = vst.msk [vmem:[#allocation2 + $0xa] sm:$0xff] %vm1061_vm6, %v1057_v5  ;;  %v1043_v11 = vadd.f32 %v2074_v58, %v1042_v7 }
 0x18b   : > { %v2149_v12 = vpop.f32.mrf.mxu0 }
 0x18c   : > { %v1058_v13 = vmax.f32 %v1043_v11, 0.0 }
 0x18d   : > { %v1047_v14 = vpop.f32.mrf.mxu0 }
 0x18e   : > { %1065 = vst.msk [vmem:[#allocation2 + $0x12] sm:$0x1] %vm1064_vm7, %v1058_v13  ;;  %v1048_v17 = vadd.f32 %v2074_v58, %v1047_v14 }
 0x18f   : > { %1067 = vst.msk [vmem:[#allocation2 + $0x16] sm:$0xfe] %vm1066_vm8, %v1058_v13  ;;  %v2152_v18 = vpop.f32.mrf.mxu0 }
 0x190   : > { %v1059_v19 = vmax.f32 %v1048_v17, 0.0 }
 0x191   : > { %v1077_v20 = vld [vmem:[#allocation2 + $0x1] ss:$2 sm:$0xff]  ;;  %v1052_v21 = vpop.f32.mrf.mxu0  ;;  %v1071_v23 = vld [vmem:[#allocation2] ss:$2 sm:$0xff] }
 0x192   : > { %1068 = vst.msk [vmem:[#allocation2 + $0x1e] sm:$0xff] %vm1061_vm6, %v1059_v19  ;;  %1082 = vrot.lane.b32.xlu1 %v1077_v20, %s2409_s29  ;;  %v1053_v22 = vadd.f32 %v2074_v58, %v1052_v21  ;;  %1074 = vst.msk [vmem:[#allocation3] sm:$0xff] %vm1061_vm6, %v1071_v23  ;;  %v1073_v26 = vld [vmem:[#allocation2 + $0x10] ss:$2 sm:$0x1] }
 0x193   : > { %v2155_v25 = vpop.f32.mrf.mxu0  ;;  %1075 = vst.msk [vmem:[#allocation3 + $0x8] sm:$0x1] %vm1064_vm7, %v1073_v26  ;;  %v1093_v29 = vld [vmem:[#allocation2 + $0x2] ss:$2 sm:$0xff]  ;;  %v1109_v30 = vld [vmem:[#allocation2 + $0x3] ss:$2 sm:$0xff] }
 0x194   : > { %v1060_v28 = vmax.f32 %v1053_v22, 0.0  ;;  %v1079_v34 = vld [vmem:[#allocation2 + $0x11] ss:$2 sm:$0x1]  ;;  %v2089_v26 = vld [vmem:[%s2904_s6] ss:$0 sm:$0xff] }
 0x195   : > { %v1095_v35 = vld [vmem:[#allocation2 + $0x12] ss:$2 sm:$0x1] }
 0x196   : > { %1070 = vst.msk [vmem:[#allocation2 + $0x26] sm:$0x3] %vm1069_vm9, %v1060_v28  ;;  %1098 = vrot.lane.b32.xlu1 %v1093_v29, %s2410_s27 }
 0x199   : > { %v1131_v31 = vld [vmem:[#allocation2 + $0x16] ss:$2 sm:$0xff]  ;;  %v1125_v32 = vld [vmem:[#allocation2 + $0x15] ss:$2 sm:$0xff] }
 0x19a   : > { %1114 = vrot.lane.b32.xlu1 %v1109_v30, %s2411_s28  ;;  %1136 = vrot.lane.b32.xlu0 %v1131_v31, %s2409_s29  ;;  %1128 = vst.msk [vmem:[#allocation3 + $0x9] sm:$0xff] %vm1061_vm6, %v1125_v32  ;;  %v1127_v33 = vld [vmem:[#allocation2 + $0x25] ss:$2 sm:$0x1] }
 0x19b   : > { %1129 = vst.msk [vmem:[#allocation3 + $0x11] sm:$0x1] %vm1064_vm7, %v1127_v33  ;;  %v1145_v37 = vld [vmem:[#allocation2 + $0x17] ss:$2 sm:$0xff] }
 0x19d   : > { %v1159_v38 = vld [vmem:[#allocation2 + $0x18] ss:$2 sm:$0xff]  ;;  %v1147_v40 = vld [vmem:[#allocation2 + $0x27] ss:$2 sm:$0x1] }
 0x19e   : > { %1084 = vrot.lane.b32.xlu1 %v1079_v34, %s2409_s29  ;;  %v1133_v39 = vld [vmem:[#allocation2 + $0x26] ss:$2 sm:$0x1] }
 0x1a2   : > { %1100 = vrot.lane.b32.xlu1 %v1095_v35, %s2410_s27 }
 0x1a6   : > { %1116 = vrot.lane.b32.xlu1 %v1111_v36, %s2411_s28 }
 0x1aa   : > { %1150 = vrot.lane.b32.xlu1 %v1145_v37, %s2410_s27 }
 0x1ae   : > { %1164 = vrot.lane.b32.xlu1 %v1159_v38, %s2411_s28 }
 0x1b2   : > { %1138 = vrot.lane.b32.xlu1 %v1133_v39, %s2409_s29 }
 0x1b6   : > { %1152 = vrot.lane.b32.xlu1 %v1147_v40, %s2410_s27 }
 0x1ba   : > { %1166 = vrot.lane.b32.xlu1 %v1161_v41, %s2411_s28 }
 0x204   : > { %v1083_v42 = vpop.permute.xlu1 %1082 }
 0x205   : > { %1089 = vst.msk [vmem:[#allocation3] sm:$0xff] %vm1088_vm10, %v1083_v42 }
 0x208   : > { %v1099_v43 = vpop.permute.xlu1 %1098 }
 0x209   : > { %1105 = vst.msk [vmem:[#allocation3] sm:$0xff] %vm1104_vm11, %v1099_v43 }
 0x20c   : > { %v1115_v44 = vpop.permute.xlu1 %1114  ;;  %v1137_v45 = vpop.permute.xlu0 %1136 }
 0x20d   : > { %1121 = vst.msk [vmem:[#allocation3] sm:$0xff] %vm1120_vm12, %v1115_v44 }
 0x20e   : > { %1142 = vst.msk [vmem:[#allocation3 + $0x9] sm:$0xff] %vm1088_vm10, %v1137_v45 }
 0x210   : > { %v1085_v46 = vpop.permute.xlu1 %1084 }
 0x211   : > { %1091 = vst.msk [vmem:[#allocation3 + $0x8] sm:$0x1] %vm1090_vm13, %v1085_v46 }
 0x214   : > { %v1101_v47 = vpop.permute.xlu1 %1100  ;;  %v1172_v49 = vld [vmem:[#allocation3] sm:$0xff] }
 0x215   : > { %1107 = vst.msk [vmem:[#allocation3 + $0x8] sm:$0x1] %vm1106_vm14, %v1101_v47  ;;  %2173 = vmatmul.mubr.msk.f32.vlgmr.msra.gmra.mxu0 %vm1190_vm15, %v1172_v49 }
 0x216   : > { %2175 = vmatprep.mubr.msk.f32.mxu0 %vm2407_vm4, %v2406_v3 }
 0x218   : > { %v1117_v50 = vpop.permute.xlu1 %1116 }
 0x219   : > { %1123 = vst.msk [vmem:[#allocation3 + $0x8] sm:$0x1] %vm1122_vm0, %v1117_v50 }
 0x21c   : > { %v1151_v51 = vpop.permute.xlu1 %1150 }
 0x21d   : > { %1156 = vst.msk [vmem:[#allocation3 + $0x9] sm:$0xff] %vm1104_vm11, %v1151_v51 }
 0x220   : > { %v1165_v53 = vpop.permute.xlu1 %1164 }
 0x221   : > { %1170 = vst.msk [vmem:[#allocation3 + $0x9] sm:$0xff] %vm1120_vm12, %v1165_v53 }
 0x224   : > { %v1139_v54 = vpop.permute.xlu1 %1138 }
 0x225   : > { %1143 = vst.msk [vmem:[#allocation3 + $0x11] sm:$0x1] %vm1090_vm13, %v1139_v54 }
 0x228   : > { %v1153_v55 = vpop.permute.xlu1 %1152  ;;  %v1173_v58 = vld [vmem:[#allocation3 + $0x8] sm:$0xff] }
 0x229   : > { %1157 = vst.msk [vmem:[#allocation3 + $0x11] sm:$0x1] %vm1106_vm14, %v1153_v55  ;;  %2176 = vmatmul.mubr.msk.f32.gmra.mxu0 %vm1190_vm15, %v1173_v58 }
 0x22a   : > { %2185 = vmatprep.mubr.msk.f32.mxu0 %vm2407_vm4, %v2406_v3 }
 0x22c   : > { %v1167_v59 = vpop.permute.xlu1 %1166 }
 0x22d   : > { %1171 = vst.msk [vmem:[#allocation3 + $0x11] sm:$0x1] %vm1122_vm0, %v1167_v59 }
 0x234   : > { %v1174_v61 = vld [vmem:[#allocation3 + $0x10] sm:$0x3] }
 0x235   : > { %2179 = vmatmul.mubr.msk.f32.vlgmr.msra.gmra.mxu1 %vm1190_vm15, %v1174_v61 }
 0x236   : > { %2195 = vmatpush3.msk.msra.mxu1 %vm962_vm3, %v1727_v60  ;;  %2196 = vmatprep.mubr.msk.f32.mxu1 %vm2407_vm4, %v2406_v3  ;;  %vm1700_vm3 = vcmask 72704  }
 0x239   : > { %2197 = vmatmul.mubr.msk.f32.vlgmr.msra.gmra.mxu1 %vm951_vm5, %v2602_v6  ;;  %v1284_v6 = vld [vmem:[%s2903_s5 + $0x8] sm:$0xff] }
 0x23a   : > { %2199 = vmatprep.mubr.msk.f32.mxu1 %vm2407_vm4, %v2406_v3  ;;  %2182 = vmatpush3.msra.mxu0 %v1284_v6 }
 0x23b   : > { %2183 = vmatprep.subr.mxu0 %v2406_v3 }
 0x23d   : > { %2200 = vmatmul.mubr.msk.f32.gmra.mxu1 %vm951_vm5, %v2627_v48  ;;  %v1283_v48 = vld [vmem:[%s2903_s5] sm:$0xff] }
 0x23e   : > { %2202 = vmatprep.mubr.msk.f32.mxu1 %vm2407_vm4, %v2406_v3  ;;  %2184 = vmatpush3.msra.mxu0 %v1283_v48 }
 0x241   : > { %2203 = vmatmul.mubr.msk.f32.gmra.mxu1 %vm951_vm5, %v2632_v52  ;;  %v2085_v52 = vld [vmem:[%s2902_s4] ss:$0 sm:$0xff] }
 0x242   : > { %2205 = vmatprep.mubr.msk.f32.mxu1 %vm2407_vm4, %v2406_v3 }
 0x245   : > { %2206 = vmatmul.mubr.msk.f32.gmra.mxu1 %vm951_vm5, %v2641_v56 }
 0x246   : > { %2208 = vmatprep.mubr.msk.f32.mxu1 %vm2407_vm4, %v2406_v3 }
 0x249   : > { %2209 = vmatmul.mubr.msk.f32.gmra.mxu1 %vm951_vm5, %v2648_v57 }
 0x2d5   : > { %v1266_v56 = vpop.f32.mrf.mxu0 }
 0x2d6   : > { %v1267_v62 = vadd.f32 %v2085_v52, %v1266_v56 }
 0x2d7   : > { %v2174_v63 = vpop.f32.mrf.mxu0 }
 0x2d8   : > { %v1280_v57 = vmax.f32 %v1267_v62, 0.0 }
 0x2da   : > { %2186 = vmatmul.mubr.msk.f32.vlgmr.msra.gmra.mxu0 %vm1061_vm6, %v1280_v57 }
 0x2db   : > { %2188 = vmatprep.mubr.msk.f32.mxu0 %vm2407_vm4, %v2406_v3 }
 0x2e9   : > { %v1271_v0 = vpop.f32.mrf.mxu0 }
 0x2ea   : > { %v1272_v1 = vadd.f32 %v2085_v52, %v1271_v0 }
 0x2eb   : > { %v2177_v2 = vpop.f32.mrf.mxu0 }
 0x2ec   : > { %v1281_v4 = vmax.f32 %v1272_v1, 0.0 }
 0x2ee   : > { %2189 = vmatmul.mubr.msk.f32.gmra.mxu0 %vm1061_vm6, %v1281_v4 }
 0x2ef   : > { %2191 = vmatprep.mubr.msk.f32.mxu0 %vm2407_vm4, %v2406_v3  ;;  %vm1712_vm4 = vcmask 7168  }
 0x2f5   : > { %v1276_v5 = vpop.f32.mrf.mxu1 }
 0x2f6   : > { %v1277_v7 = vadd.f32 %v2085_v52, %v1276_v5 }
 0x2f7   : > { %v2180_v8 = vpop.f32.mrf.mxu1 }
 0x2f8   : > { %v1282_v11 = vmax.f32 %v1277_v7, 0.0 }
 0x2f9   : > { %v1804_v12 = vpop.f32.mrf.mxu1 }
 0x2fa   : > { %v1805_v13 = vadd.f32 %v2096_v9, %v1804_v12  ;;  %2192 = vmatmul.mubr.msk.f32.gmra.mxu0 %vm1061_vm6, %v1282_v11 }
 0x2fb   : > { %v2198_v14 = vpop.f32.mrf.mxu1 }
 0x2fc   : > { %1829 = vst.msk [vmem:[#allocation4] sm:$0xff] %vm1828_vm1, %v1805_v13 }
 0x2fd   : > { %v1809_v15 = vpop.f32.mrf.mxu1 }
 0x2fe   : > { %v1810_v16 = vadd.f32 %v2096_v9, %v1809_v15 }
 0x2ff   : > { %v2201_v17 = vpop.f32.mrf.mxu1 }
 0x300   : > { %1830 = vst.msk [vmem:[#allocation4 + $0x8] sm:$0xff] %vm1828_vm1, %v1810_v16 }
 0x301   : > { %v1814_v3 = vpop.f32.mrf.mxu1 }
 0x302   : > { %v1815_v18 = vadd.f32 %v2096_v9, %v1814_v3 }
 0x303   : > { %v2204_v19 = vpop.f32.mrf.mxu1 }
 0x304   : > { %1831 = vst.msk [vmem:[#allocation4 + $0x10] sm:$0xff] %vm1828_vm1, %v1815_v18 }
 0x305   : > { %v1819_v20 = vpop.f32.mrf.mxu1 }
 0x306   : > { %v1820_v21 = vadd.f32 %v2096_v9, %v1819_v20 }
 0x307   : > { %v2207_v22 = vpop.f32.mrf.mxu1 }
 0x308   : > { %1832 = vst.msk [vmem:[#allocation4 + $0x18] sm:$0xff] %vm1828_vm1, %v1820_v21 }
 0x309   : > { %v1824_v23 = vpop.f32.mrf.mxu1 }
 0x30a   : > { %v1825_v24 = vadd.f32 %v2096_v9, %v1824_v23 }
 0x30b   : > { %v2210_v25 = vpop.f32.mrf.mxu1 }
 0x30c   : > { %1834 = vst.msk [vmem:[#allocation4 + $0x20] sm:$0x3] %vm1833_vm2, %v1825_v24 }
 0x39a   : > { %v1367_v27 = vpop.f32.mrf.mxu0 }
 0x39b   : > { %v1368_v28 = vadd.f32 %v2089_v26, %v1367_v27 }
 0x39c   : > { %v2187_v29 = vpop.f32.mrf.mxu0 }
 0x39d   : > { %v1384_v30 = vcombine.high %v1368_v28, %v1368_v28  ;;  %v1391_v31 = vrot.slane %v1368_v28, %v2570_v10 }
 0x39f   : > { %v1398_v32 = vrot.slane %v1384_v30, %v2570_v10  ;;  %v1399_v33 = vcombine.high %v1391_v31, %v1391_v31  ;;  %v1407_v35 = vrot.slane %v1391_v31, %v2570_v10 }
 0x3a1   : > { %v1400_v34 = vcombine.high %v1398_v32, %v1398_v32  ;;  %v1421_v36 = vrot.slane %v1399_v33, %v2570_v10  ;;  %v1414_v37 = vrot.slane %v1398_v32, %v2570_v10 }
 0x3a3   : > { %v1428_v38 = vrot.slane %v1400_v34, %v2570_v10  ;;  %v1504_v39 = vcombine.low %v1407_v35, %v1421_v36  ;;  %v2093_v40 = vcombine.high %v1407_v35, %v1421_v36  ;;  %v1839_v36 = vld [vmem:[#allocation4 + $0x11] ss:$2 sm:$0xff] }
 0x3a5   : > { %v1506_v41 = vcombine.low %v1414_v37, %v1428_v38  ;;  %v2094_v42 = vcombine.high %v1414_v37, %v1428_v38  ;;  %v1514_v43 = vrot.slane %v1504_v39, %v2570_v10  ;;  %v1521_v44 = vrot.slane %v2093_v40, %v2570_v10  ;;  %v1841_v37 = vld [vmem:[#allocation4 + $0x21] ss:$2 sm:$0x1]  ;;  %v1835_v38 = vld [vmem:[#allocation4] ss:$2 sm:$0xff] }
 0x3a6   : > { %v1837_v39 = vld [vmem:[#allocation4 + $0x10] ss:$2 sm:$0x1] }
 0x3a7   : > { %v1528_v45 = vrot.slane %v1506_v41, %v2570_v10  ;;  %v1535_v46 = vrot.slane %v2094_v42, %v2570_v10  ;;  %v1536_v47 = vcombine.low %v1514_v43, %v1521_v44  ;;  %v1703_v42 = vld [vmem:[#allocation7] sm:$0xff] }
 0x3a9   : > { %v1537_v49 = vcombine.low %v1528_v45, %v1535_v46  ;;  %v1544_v50 = vrot.slane %v1536_v47, %v2570_v10  ;;  %v1715_v45 = vld [vmem:[#allocation7 + $0x8] sm:$0xff] }
 0x3ab   : > { %v1551_v51 = vrot.slane %v1537_v49, %v2570_v10 }
 0x3ad   : > { %v1552_v53 = vcombine.low %v1544_v50, %v1551_v51 }
 0x3ae   : > { %v1372_v54 = vpop.f32.mrf.mxu0 }
 0x3af   : > { %v1373_v55 = vadd.f32 %v2089_v26, %v1372_v54  ;;  %1634 = vxpose.xlu1.b32.start [1/2] (short) (narrow) %v1552_v53, 8 }
 0x3b0   : > { %v2190_v58 = vpop.f32.mrf.mxu0 }
 0x3b1   : > { %v1433_v59 = vcombine.high %v1373_v55, %v1373_v55  ;;  %v1440_v60 = vrot.slane %v1373_v55, %v2570_v10 }
 0x3b3   : > { %v1447_v61 = vrot.slane %v1433_v59, %v2570_v10  ;;  %v1448_v6 = vcombine.high %v1440_v60, %v1440_v60  ;;  %v1456_v48 = vrot.slane %v1440_v60, %v2570_v10 }
 0x3b5   : > { %v1470_v52 = vrot.slane %v1448_v6, %v2570_v10  ;;  %v1559_v56 = vrot.slane %v1456_v48, %v2570_v10  ;;  %v1449_v62 = vcombine.high %v1447_v61, %v1447_v61  ;;  %v1463_v63 = vrot.slane %v1447_v61, %v2570_v10 }
 0x3b6   : > { %v1478_v1 = vcombine.high %v1456_v48, %v1456_v48 }
 0x3b7   : > { %v1480_v57 = vcombine.high %v1470_v52, %v1470_v52  ;;  %v1566_v0 = vrot.slane %v1559_v56, %v2570_v10  ;;  %v1477_v4 = vrot.slane %v1449_v62, %v2570_v10  ;;  %v1479_v5 = vcombine.high %v1463_v63, %v1463_v63 }
 0x3b8   : > { %v1567_v11 = vcombine.low %v1470_v52, %v1478_v1 }
 0x3b9   : > { %1635 = vxpose.xlu1.b32.end [2/2] (short) (narrow) %v1566_v0, 8  ;;  %v1568_v7 = vcombine.low %v1480_v57, %v1463_v63  ;;  %v1569_v13 = vcombine.low %v1477_v4, %v1479_v5  ;;  %v1481_v14 = vcombine.high %v1477_v4, %v1477_v4 }
 0x3ba   : > { %v1377_v2 = vpop.f32.mrf.mxu0  ;;  %v1577_v18 = vrot.slane %v1567_v11, %v2570_v10 }
 0x3bb   : > { %v1378_v8 = vadd.f32 %v2089_v26, %v1377_v2  ;;  %v1584_v16 = vrot.slane %v1568_v7, %v2570_v10  ;;  %v1591_v20 = vrot.slane %v1569_v13, %v2570_v10 }
 0x3bc   : > { %v2193_v9 = vpop.f32.mrf.mxu0 }
 0x3bd   : > { %v1488_v12 = vrot.slane %v1378_v8, %v2570_v10  ;;  %v1599_v21 = vcombine.low %v1577_v18, %v1584_v16 }
 0x3bf   : > { %v1496_v15 = vrot.slane %v1488_v12, %v2570_v10  ;;  %v1489_v17 = vcombine.high %v1488_v12, %v1488_v12  ;;  %v1607_v24 = vrot.slane %v1599_v21, %v2570_v10 }
 0x3c1   : > { %v1570_v3 = vcombine.low %v1481_v14, %v1496_v15  ;;  %v1503_v22 = vrot.slane %v1489_v17, %v2570_v10 }
 0x3c3   : > { %v1598_v19 = vrot.slane %v1570_v3, %v2570_v10  ;;  %v1622_v26 = vrot.slane %v1503_v22, %v2570_v10 }
 0x3c5   : > { %v1600_v23 = vcombine.low %v1591_v20, %v1598_v19  ;;  %v1629_v28 = vrot.slane %v1622_v26, %v2570_v10 }
 0x3c7   : > { %v1614_v25 = vrot.slane %v1600_v23, %v2570_v10 }
 0x3c9   : > { %v1615_v27 = vcombine.low %v1607_v24, %v1614_v25 }
 0x3cb   : > { %1666 = vxpose.xlu0.b32.start [1/2] (short) (narrow) %v1615_v27, 8 }
 0x3cf   : > { %1667 = vxpose.xlu0.b32.end [2/2] (short) (narrow) %v1629_v28, 8 }
 0x431   : > { %v1650_v29 = vpop.trf.xlu1 }
 0x432   : > { %1701 = vst.msk [vmem:[%s1699_s17] sm:$0xff] %vm1700_vm3, %v1650_v29  ;;  %v1704_v30 = vsel %vm1700_vm3, %v1650_v29, 0.0  ;;  %v1716_v31 = vmul.f32 %v1650_v29, %v1650_v29 }
 0x433   : > { %1705 = vadd.xlane.f32.xlu1 %v1704_v30 }
 0x434   : > { %v1718_v32 = vsel %vm1700_vm3, %v1716_v31, 0.0 }
 0x437   : > { %1719 = vadd.xlane.f32.xlu1 %v1718_v32 }
 0x447   : > { %v1682_v33 = vpop.trf.xlu0 }
 0x448   : > { %1702 = vst.msk [vmem:[%s1699_s17 + $0x8] sm:$0xff] %vm1700_vm3, %v1682_v33  ;;  %v1707_v10 = vsel %vm1700_vm3, %v1682_v33, 0.0  ;;  %v1717_v34 = vmul.f32 %v1682_v33, %v1682_v33 }
 0x449   : > { %1708 = vadd.xlane.f32.xlu0 %v1707_v10 }
 0x44a   : > { %v1721_v35 = vsel %vm1700_vm3, %v1717_v34, 0.0 }
 0x44b   : > { %1722 = vadd.xlane.f32.xlu1 %v1721_v35 }
 0x476   : > { %1874 = vxpose.xlu0.b32.start [1/2] (short) (narrow) %v1839_v36, 8 }
 0x47a   : > { %1875 = vxpose.xlu0.b32.end [2/2] (short) (narrow) %v1841_v37, 8 }
 0x47e   : > { %1842 = vxpose.xlu1.b32.start [1/2] (short) (narrow) %v1835_v38, 8 }
 0x482   : > { %1843 = vxpose.xlu1.b32.end [2/2] (short) (narrow) %v1837_v39, 8 }
 0x4bc   : > { %v1706_v40 = vpop.xlane.xlu1 %1705 }
 0x4c0   : > { %v1720_v41 = vpop.xlane.xlu1 %1719 }
 0x4d2   : > { %v1709_v43 = vpop.xlane.xlu0 %1708 }
 0x4d3   : > { %v1710_v44 = vadd.f32 %v1709_v43, %v1706_v40 }
 0x4d4   : > { %v1723_v46 = vpop.xlane.xlu1 %1722 }
 0x4d5   : > { %v1711_v47 = vadd.f32 %v1710_v44, %v1703_v42  ;;  %v1724_v49 = vadd.f32 %v1723_v46, %v1720_v41 }
 0x4d7   : > { %1713 = vst.msk [vmem:[#allocation7] sm:$0xff] %vm1712_vm4, %v1711_v47  ;;  %v1725_v50 = vadd.f32 %v1724_v49, %v1715_v45 }
 0x4d9   : > { %1726 = vst.msk [vmem:[#allocation7 + $0x8] sm:$0xff] %vm1712_vm4, %v1725_v50 }
 0x4f2   : > { %v1890_v51 = vpop.trf.xlu0 }
 0x4f3   : > { %1908 = vst.msk [vmem:[%s1906_s22 + $0x8] sm:$0xff] %vm1700_vm3, %v1890_v51 }
 0x4fa   : > { %v1858_v53 = vpop.trf.xlu1 }
 0x4fb   : > { %1907 = vst.msk [vmem:[%s1906_s22] sm:$0xff] %vm1700_vm3, %v1858_v53 }
 0x4fc PF: > { %p1909_p1 = scmp.eq.s32.totalorder %s2391_s21, 1  ;;  %p1910_p2 = scmp.eq.s32.totalorder %s2387_s20, 0 }
 0x4fe   : > { %p1911_p3 = pnand %p1910_p2, %p1909_p1 }
 0x500   : > { %1914 = sbr.rel (%p1911_p3) target bundleno = 1317 (0x525), region = 76 }
 0x505   : > { %v1915_v54 = vld [vmem:[#allocation7] sm:$0xff]  ;;  %v1918_v55 = vld [vmem:[#allocation7 + $0x8] sm:$0xff]  ;;  %v1925_v52 = vld [vmem:[%s2905_s7] sm:$0xff]  ;;  %vm1927_vm5 = vcmask 7168  }
 0x506   : > { %v1916_v58 = vmul.f32 0.027777778, %v1915_v54  ;;  %v1919_v59 = vmul.f32 0.027777778, %v1918_v55  ;;  %v1929_v63 = vld [vmem:[%s2906_s8] sm:$0xff] }
 0x508   : > { %v1920_v60 = vmul.f32 %v1916_v58, %v1916_v58 }
 0x50a   : > { %v1921_v61 = vsub.f32 %v1919_v59, %v1920_v60 }
 0x50c   : > { %v1922_v6 = vmax.f32 %v1921_v61, 0.0 }
 0x50e   : > { %v1923_v48 = vadd.f32 1e-05, %v1922_v6 }
 0x510   : > { %2308 = vrsqrt.f32 %v1923_v48 }
 0x51d   : > { %v2309_v56 = vpop.eup %2308 }
 0x51e   : > { %v1926_v62 = vmul.f32 %v2309_v56, %v1925_v52 }
 0x520   : > { %1928 = vst.msk [vmem:[#allocation8] sm:$0xff] %vm1927_vm5, %v1926_v62  ;;  %v1930_v57 = vmul.f32 %v1926_v62, %v1916_v58 }
 0x522   : > { %v1931_v0 = vsub.f32 %v1929_v63, %v1930_v57 }
 0x524   : > { %1933 = vst.msk [vmem:[#allocation8 + $0x8] sm:$0xff] %vm1927_vm5, %v1931_v0 }
 0x525 PF: > { %p2103_p4 = scmp.ne.s32.totalorder %s2391_s21, 1 }
 0x526   : > { %s2104_s26 = sshll.u32 (!%p2103_p4), %s2387_s20, 4 }
 0x527   : > { %1936 = sbr.rel (%p2103_p4) target bundleno = 1461 (0x5b5), region = 80  ;;  %s1938_s29 = scalar_lea.vmem (!%p2103_p4), [#allocation5], %s2104_s26 }
 0x528   : > { %s1958_s13 = scalar_lea.vmem (!%p2103_p4), [#allocation6], %s2104_s26 }
 0x52c   : > { %v1941_v1 = vld [vmem:[#allocation8] sm:$0xff]  ;;  %v2412_v2 = vmov 0   ;;  %v1950_v4 = vld [vmem:[#allocation8 + $0x8] sm:$0xff]  ;;  %vm1965_vm6 = vcmask 72704  }
 0x52d   : > { %2310 = vset.pattern.permute.xlu0 %v2412_v2  ;;  %v1939_v7 = vld [vmem:[%s1938_s29] sm:$0xff]  ;;  %v1940_v8 = vld [vmem:[%s1938_s29 + $0x8] sm:$0xff] }
 0x52e   : > { %1944 = vperm.xlu0 %2310, %v1941_v1   ;;  %v1959_v13 = vld [vmem:[%s1958_s13] sm:$0xff]  ;;  %v1960_v14 = vld [vmem:[%s1958_s13 + $0x8] sm:$0xff] }
 0x532   : > { %1953 = vperm.xlu0 %2310, %v1950_v4  }
 0x5a9   : > { %v1945_v5 = vpop.permute.xlu0 %1944 }
 0x5aa   : > { %v1947_v9 = vmul.f32 %v1945_v5, %v1939_v7  ;;  %v1948_v11 = vmul.f32 %v1945_v5, %v1940_v8 }
 0x5ad   : > { %v1954_v12 = vpop.permute.xlu0 %1953 }
 0x5ae   : > { %v1956_v15 = vadd.f32 %v1954_v12, %v1947_v9  ;;  %v1957_v16 = vadd.f32 %v1954_v12, %v1948_v11 }
 0x5b0   : > { %v1961_v17 = vadd.f32 %v1959_v13, %v1956_v15  ;;  %v1962_v3 = vadd.f32 %v1960_v14, %v1957_v16 }
 0x5b2   : > { %v1963_v18 = vmax.f32 %v1961_v17, 0.0  ;;  %v1964_v19 = vmax.f32 %v1962_v3, 0.0 }
 0x5b4   : > { %1966 = vst.msk [vmem:[%s2555_s14] sm:$0xff] %vm1965_vm6, %v1963_v18  ;;  %1967 = vst.msk [vmem:[%s2555_s14 + $0x8] sm:$0xff] %vm1965_vm6, %v1964_v19 }
 0x5b5 PF: > { %s1976_s17 = smul.u32 %s2387_s20, %s2391_s21  ;;  %s1983_s22 = sshll.u32 %s2555_s14, 4  ;;  %s2838_s22 = int_to_ptr.vmem [resolvable:$true] %s1983_s22 }
 0x5b6   : > { %s2847_s26 = scalar_lea.sflag [#allocation10], %s402_s25  ;;  %s2311_s29 = scalar_lea.vmem %s2838_s22, 256 }
 0x5b7   : > { %s2110_s23 = sshll.u32 %s1976_s17, 8  ;;  %p2312_p5 = scmp.ne.s32.totalorder %s2838_s22, %s2311_s29 }
 0x5b8   : > { %s2843_s15 = scalar_lea.hbm %s2909_s11, %s2110_s23  ;;  %s2413_s20 = smov [#allocation9]  }
 0x5b9   : > { %p2313_p7 = pnand %p2312_p5, %p2529_p6  ;;  %s2315_s21 = sshll.u32 %s2413_s20, 4  ;;  %s2316_s21 = int_to_ptr.vmem [resolvable:$false] %s2315_s21 }
 0x5ba   : > { %s2317_s14 = scalar_lea.vmem %s2316_s21, 512  ;;  %p2318_p10 = scmp.lt.s32.totalorder %s2838_s22, %s2316_s21 }
 0x5bb   : > { %p2314_p9 = pneg %p2313_p7  ;;  %p2319_p11 = scmp.lt.s32.totalorder %s2317_s14, %s2311_s29 }
 0x5bd   : > { %p2320_p12 = por %p2319_p11, %p2318_p10 }
 0x5bf   : > { %p2321_p13 = pnand %p2320_p12, %p2314_p9 }
 0x5c1   : > { %2324 = shalt.err (!%p2321_p13)
}
 0x5c2   : > { %s2325_s25 = scalar_lea.hbm %s2843_s15, 256  ;;  %s2329_s23 = scalar_lea.hbm %s2909_s11, 512 }
 0x5c3   : > { %p2326_p0 = scmp.ne.s32.totalorder %s2843_s15, %s2325_s25  ;;  %p2330_p3 = scmp.lt.s32.totalorder %s2843_s15, %s2909_s11 }
 0x5c4   : > { %p2331_p4 = scmp.lt.s32.totalorder %s2329_s23, %s2325_s25 }
 0x5c5   : > { %p2327_p1 = pnand %p2326_p0, %p2529_p6 }
 0x5c6   : > { %p2332_p5 = por %p2331_p4, %p2330_p3 }
 0x5c7   : > { %p2328_p2 = pneg %p2327_p1 }
 0x5c9   : > { %p2333_p7 = pnand %p2332_p5, %p2328_p2 }
 0x5cb   : > { %2336 = shalt.err (!%p2333_p7)
}
 0x5cc   : > { %s2414_s29 = smov 128   ;;  %s2415_s20 = smov 8  }
 0x5cd   : > { %2227 = dma.vmem_to_hbm [thread:$0]  (%p2529_p6), %s2838_s22, 256, %s2843_s15, %s2847_s26, %s2414_s29, %s2414_s29, %s2415_s20  }
 0x5ce PF: > { %s2922_s21 = sld [smem:[#allocation12_spill]]  ;;  %p2233_p9 = scmp.ge.s32.totalorder %s2403_s24, 2 }
 0x5d0   : > { %p2230_p10 = pnand %p2233_p9, %p2536_p8 }
 0x5d2   : > { %p2231_p11 = pneg %p2230_p10 }
 0x5d4   : > { %s1998_s14 = sand.u32 1, %s2922_s21  }
 0x5d5   : > { %s1999_s25 = scalar_lea.sflag [#allocation10], %s1998_s14 }
 0x5d6   : > { %2370 = dma.done.wait (%p2231_p11), %s1999_s25, 256  }
 0x5d7   : > { %2372 = vsyncadd (%p2231_p11), %s1999_s25, 4294967040  ;;  %s24_s24 = sadd.s32 1, %s2403_s24   ;;  %s2923_s20 = sld [smem:[#allocation13_spill]] }
 0x5d8   : > { %p21_p12 = scmp.ge.s32.totalorder %s24_s24, 6   ;;  %s2924_s21 = sld [smem:[#allocation14_spill]] }
 0x5d9   : > { %s2925_s22 = sld [smem:[#allocation15_spill]]  ;;  %s2927_s17 = smov %s2379_s18 }
 0x5da   : > { %s2926_s23 = sld [smem:[#allocation16_spill]]  ;;  %s2928_s18 = smov %s2383_s19 }
 0x5db   : > { %s2929_s19 = smov %s2545_s16  ;;  %23 = sbr.rel (!%p21_p12) target bundleno = 5 (0x5), region = 141 }
 0x5e0   :  { %2004 = vsyncpa [#allocation10], 1 }
 0x5e1   :  { %2006 = vsyncpa [#allocation10 + $0x1], 1 }

</bundles_post_ra>
